<compile_context>
chip_gen: v5e
topology: v5e:2x2
jax: 0.10.0
libtpu: 0.0.40
codegen_flags: <defaults>
</compile_context>

<pallas_src>
import math

import jax
import jax.numpy as jnp
from jax import lax
from jax.experimental import pallas as pl
from jax.experimental.pallas import tpu as pltpu

EPS = 1e-5        # PyTorch BatchNorm2d default eps
GAMMA = 0.1       # cfg.gamma (confidence_ratio)
_UNROLL_H = 32    # statically unroll the per-row loops below this H


def make_fused_kernel(C, H, W, gamma, x_dtype):
    HW = H * W
    # torch.quantile linear-interpolation constants (static, fp-noise guarded)
    pos = gamma * (C - 1)
    k0 = min(int(math.floor(pos + 1e-9)), C - 1)
    frac = pos - k0
    if frac < 1e-9:
        frac = 0.0
    has_hi = (frac > 0.0) and (k0 + 1 <= C - 1)

    def per_row(body):
        # Row loop over H: statically unrolled when H is small (all-static
        # indices); rolled otherwise (dynamic indexing only on first axes).
        if H <= _UNROLL_H:
            for h in range(H):
                body(h)
        else:
            lax.fori_loop(0, H, lambda h, c: (body(h), c)[1], 0)

    def kernel(x_ref, bn1_ref, wqkv_ref, wfc_ref, ws_s2_ref, ws_b2_ref,
               o_ref, qkv_ref):
        # x_ref:     (1, C, H, W)  x_dtype (bf16 in production)
        # bn1_ref:   (C, 2)        f32  [s1, b1]  folded BN of self.norm (eval)
        # wqkv_ref:  (3C, C)       f32  stacked channel q/k/v weights
        # wfc_ref:   (C, C)        f32
        # ws_s2_ref: (3, C)        f32  spatial weights * BN2 scale  (folded)
        # ws_b2_ref: (3, C)        f32  spatial weights * BN2 bias   (folded)
        # o_ref:     (1, 1, H, W)  f32
        # qkv_ref:   (H, 3, W)     f32 scratch holding spatial q/k/v rows
        ones_w = jnp.ones((W, 1), x_dtype)

        # --- GlobalAvgPool: f32 accumulation via MXU ones-matvec per row -----
        # (Dropout3d / BatchNorm in eval mode.)
        if H <= _UNROLL_H:
            gap = jnp.zeros((C, 1), jnp.float32)
            for h in range(H):
                gap = gap + jnp.dot(x_ref[0, :, h, :], ones_w,
                                    preferred_element_type=jnp.float32)
        else:
            gap = lax.fori_loop(
                0, H,
                lambda h, acc: acc + jnp.dot(x_ref[0, :, h, :], ones_w,
                                             preferred_element_type=jnp.float32),
                jnp.zeros((C, 1), jnp.float32))
        gap = gap * (1.0 / float(HW))                       # (C, 1)

        # --- channel attention branch (f32, (C,1) column vectors) ------------
        s1 = bn1_ref[:, 0:1]
        b1 = bn1_ref[:, 1:2]
        xn = gap * s1 + b1                                  # folded BN(norm)

        qkv_c = jnp.dot(wqkv_ref[...], xn,
                        preferred_element_type=jnp.float32)        # (3C, 1)
        q = qkv_c[0:C]
        k = qkv_c[C:2 * C]
        v = qkv_c[2 * C:3 * C]

        # outer product q k^T via contract-the-size-1-dim dot (no transposes)
        scores = lax.dot_general(q, k, (((1,), (1,)), ((), ())),
                                 preferred_element_type=jnp.float32)   # (C, C)
        scores = scores - jnp.max(scores, axis=-1, keepdims=True)
        e = jnp.exp(scores)
        alpha = e / jnp.sum(e, axis=-1, keepdims=True)      # exact softmax
        att = jnp.dot(alpha, v, preferred_element_type=jnp.float32)    # (C, 1)
        att = jnp.dot(wfc_ref[...], att, preferred_element_type=jnp.float32)
        att = 1.0 / (1.0 + jnp.exp(-att))                   # sigmoid

        # --- torch.quantile(att, gamma) via rank counting -> mask ------------
        ones11 = jnp.ones((1, 1), jnp.float32)
        att_row = lax.dot_general(ones11, att, (((1,), (1,)), ((), ())),
                                  preferred_element_type=jnp.float32)  # (1, C)
        ri = lax.broadcasted_iota(jnp.int32, (C, C), 0)
        ci = lax.broadcasted_iota(jnp.int32, (C, C), 1)
        # le[i, j] = (att[j] <= att[i]); force the diagonal so ranks are exact
        le = jnp.where((ri == ci) | (att_row <= att), 1.0, 0.0)
        counts = jnp.sum(le, axis=-1, keepdims=True)        # (C, 1) ranks

        def order_stat(kk):                                 # (kk+1)-th smallest
            cand = jnp.where(counts >= (kk + 1.0), att, jnp.inf)
            return jnp.min(cand, axis=0, keepdims=True)     # (1, 1)

        s_lo = order_stat(k0)
        if has_hi:
            s_hi = order_stat(k0 + 1)
            thr = s_lo + frac * (s_hi - s_lo)
        else:
            thr = s_lo
        mask = jnp.where(att <= thr, 0.0, att)              # (C, 1)

        # --- fold residual (1+att), BN2 affine and mask into the (3,C) weights
        #   x_drop = x*(1+att)*s2*mask + b2*mask
        #   qkv[t] = (ws*s2*(1+att)*mask) @ x  +  (ws*b2) @ mask
        w_col = (1.0 + att) * mask                          # (C, 1)
        w_row = lax.dot_general(ones11, w_col, (((1,), (1,)), ((), ())),
                                preferred_element_type=jnp.float32)    # (1, C)
        ws_eff = (ws_s2_ref[...] * w_row).astype(x_dtype)   # (3, C)
        bias_eff = jnp.dot(ws_b2_ref[...], mask,
                           preferred_element_type=jnp.float32)         # (3, 1)

        # --- spatial projection: one (3, W) row per h, written exactly once --
        def project_row(h):
            chunk = x_ref[0, :, h, :]                                   # (C, W)
            qkv_ref[h] = (jnp.dot(ws_eff, chunk,
                                  preferred_element_type=jnp.float32)
                          + bias_eff)                                   # (3, W)
        per_row(project_row)

        # --- fused spatial self-attention: softmax(q k^T) v + v --------------
        qs = qkv_ref[:, 0, :]                               # (H, W)
        ks = qkv_ref[:, 1, :]
        vs = qkv_ref[:, 2, :]
        s = lax.dot_general(qs, ks, (((1,), (1,)), ((), ())),
                            preferred_element_type=jnp.float32)         # (H, H)
        s = s - jnp.max(s, axis=-1, keepdims=True)
        es = jnp.exp(s)
        inv = pl.reciprocal(jnp.sum(es, axis=-1, keepdims=True), approx=True)
        out = jnp.dot(es * inv, vs, preferred_element_type=jnp.float32) + vs

        # single whole-block output store
        o_ref[0, 0] = out

    return kernel


def _fold_bn(bn):
    g, b, m, var = bn[:, 0], bn[:, 1], bn[:, 2], bn[:, 3]
    s = g * lax.rsqrt(var + EPS)
    return s, b - m * s


def _vmem_limit_bytes(C, H, W, x_itemsize):
    x_blk = C * H * W * x_itemsize
    out_blk = H * W * 4
    w_blk = (3 * C * C + C * C + 2 * 3 * C + 2 * C) * 4
    scratch = H * 8 * max(W, 128) * 4
    est = 2 * (x_blk + out_blk + w_blk) + scratch + (8 << 20)
    return int(min(48 << 20, max(32 << 20, est)))


def union_attention_forward(x, params, gamma=GAMMA, compute_dtype=jnp.bfloat16):
    """UnionAttentionModule forward (inference / eval mode)."""
    B, C, H, W = x.shape
    x_in = x.astype(compute_dtype)                          # bf16 HBM streaming

    # host-side exact folds (BN eval is affine) + weight stacking
    s1, b1 = _fold_bn(params["bn_norm"])
    s2, b2 = _fold_bn(params["bn"])
    bn1 = jnp.stack([s1, b1], axis=1).astype(jnp.float32)             # (C, 2)
    wqkv = jnp.concatenate([params["wq"], params["wk"], params["wv"]], axis=0)
    ws_s2 = (params["ws"] * s2[None, :]).astype(jnp.float32)          # (3, C)
    ws_b2 = (params["ws"] * b2[None, :]).astype(jnp.float32)          # (3, C)

    kernel = make_fused_kernel(C, H, W, gamma, compute_dtype)
    out = pl.pallas_call(
        kernel,
        out_shape=jax.ShapeDtypeStruct((B, 1, H, W), jnp.float32),
        grid_spec=pltpu.PrefetchScalarGridSpec(
            num_scalar_prefetch=0,
            grid=(B,),
            in_specs=[
                pl.BlockSpec((1, C, H, W), lambda b: (b, 0, 0, 0)),   # x
                pl.BlockSpec((C, 2), lambda b: (0, 0)),               # BN1 (s, b)
                pl.BlockSpec((3 * C, C), lambda b: (0, 0)),           # Wq;Wk;Wv
                pl.BlockSpec((C, C), lambda b: (0, 0)),               # Wfc
                pl.BlockSpec((3, C), lambda b: (0, 0)),               # ws * s2
                pl.BlockSpec((3, C), lambda b: (0, 0)),               # ws * b2
            ],
            out_specs=pl.BlockSpec((1, 1, H, W), lambda b: (b, 0, 0, 0)),
            scratch_shapes=[pltpu.VMEM((H, 3, W), jnp.float32)],
        ),
        compiler_params=pltpu.CompilerParams(
            dimension_semantics=("parallel",),
            vmem_limit_bytes=_vmem_limit_bytes(
                C, H, W, jnp.dtype(compute_dtype).itemsize),
        ),
    )(x_in, bn1, wqkv, params["wfc"], ws_s2, ws_b2)
    return out                                              # (B, 1, H, W)


def init_params(key, C):
    ks = jax.random.split(key, 7)
    sc = 1.0 / math.sqrt(C)
    wq = sc * jax.random.normal(ks[0], (C, C), jnp.float32)
    wk = sc * jax.random.normal(ks[1], (C, C), jnp.float32)
    wv = sc * jax.random.normal(ks[2], (C, C), jnp.float32)
    wfc = sc * jax.random.normal(ks[3], (C, C), jnp.float32)
    # modest scale keeps the synthetic spatial softmax well-conditioned so the
    # bf16-streamed kernel can be checked against the reference at 5e-2.
    ws = (0.5 * sc) * jax.random.normal(ks[4], (3, C), jnp.float32)

    def bn_params(k):
        k1, k2, k3, k4 = jax.random.split(k, 4)
        g = 1.0 + 0.1 * jax.random.normal(k1, (C,), jnp.float32)
        b = 0.1 * jax.random.normal(k2, (C,), jnp.float32)
        m = 0.1 * jax.random.normal(k3, (C,), jnp.float32)
        v = 1.0 + 0.1 * jnp.abs(jax.random.normal(k4, (C,), jnp.float32))
        return jnp.stack([g, b, m, v], axis=1)              # (C,4) [g, b, mean, var]

    return dict(wq=wq, wk=wk, wv=wv, wfc=wfc, ws=ws,
                bn_norm=bn_params(ks[5]), bn=bn_params(ks[6]))


def reference_forward(x, params, gamma=GAMMA):
    # pure-JAX reference mirroring the PyTorch forward (eval mode)
    wq, wk, wv, wfc, ws = (params["wq"], params["wk"], params["wv"],
                           params["wfc"], params["ws"])
    bn1, bn2 = params["bn_norm"], params["bn"]
    gap = x.mean(axis=(2, 3))                                         # (B, C)
    xn = (gap - bn1[:, 2]) * lax.rsqrt(bn1[:, 3] + EPS) * bn1[:, 0] + bn1[:, 1]
    q = xn @ wq.T; k = xn @ wk.T; v = xn @ wv.T                       # (B, C)
    alpha = jax.nn.softmax(q[:, :, None] * k[:, None, :], axis=-1)
    att = jnp.einsum('bij,bj->bi', alpha, v) @ wfc.T
    att = jax.nn.sigmoid(att)                                         # (B, C)
    xc = x * att[:, :, None, None] + x
    xc = ((xc - bn2[:, 2][None, :, None, None])
          * lax.rsqrt(bn2[:, 3] + EPS)[None, :, None, None]
          * bn2[:, 0][None, :, None, None] + bn2[:, 1][None, :, None, None])
    thr = jnp.quantile(att, gamma, axis=-1, keepdims=True)
    mask = jnp.where(att <= thr, 0.0, att)
    x_drop = xc * mask[:, :, None, None]
    qs = jnp.einsum('c,bchw->bhw', ws[0], x_drop)
    ks_ = jnp.einsum('c,bchw->bhw', ws[1], x_drop)
    vs = jnp.einsum('c,bchw->bhw', ws[2], x_drop)
    a = jax.nn.softmax(jnp.einsum('biw,bjw->bij', qs, ks_), axis=-1)
    out = jnp.einsum('bij,bjw->biw', a, vs) + vs
    return out[:, None]


if __name__ == "__main__":
    key = jax.random.PRNGKey(0)
    kx, kp = jax.random.split(key)
    B, C, H, W = 2, 4, 16, 16
    x = jax.random.normal(kx, (B, C, H, W), jnp.float32)
    params = init_params(kp, C)

    out = union_attention_forward(x, params)        # streams x in bf16
    out = jax.block_until_ready(out)
    assert out.shape == (B, 1, H, W), out.shape

    # compare against the pure-JAX reference evaluated at the same input
    # precision the kernel consumes (bf16-rounded x); kernel accumulation is f32.
    x_q = x.astype(jnp.bfloat16).astype(jnp.float32)
    ref = reference_forward(x_q, params)
    err = float(jnp.max(jnp.abs(out - ref)))
    assert jnp.allclose(out, ref, atol=5e-2, rtol=5e-2), err

    print("KERNEL_OK")
</pallas_src>

<mosaic_0001>
module attributes {stable_mosaic.version = 11 : i64} {
  func.func @kernel(%arg0: i32, %arg1: memref<1x4x16x16xbf16, #tpu.memory_space<vmem>>, %arg2: memref<4x2xf32, #tpu.memory_space<vmem>>, %arg3: memref<12x4xf32, #tpu.memory_space<vmem>>, %arg4: memref<4x4xf32, #tpu.memory_space<vmem>>, %arg5: memref<3x4xf32, #tpu.memory_space<vmem>>, %arg6: memref<3x4xf32, #tpu.memory_space<vmem>>, %arg7: memref<1x1x16x16xf32, #tpu.memory_space<vmem>>, %arg8: memref<16x3x16xf32, #tpu.memory_space<vmem>>) attributes {dimension_semantics = [#tpu.dimension_semantics<parallel>], iteration_bounds = array<i64: 2>, scalar_prefetch = 0 : i64, scratch_operands = 1 : i64, tpu.core_type = #tpu.core_type<tc>, window_params = [{transform_indices = @transform_0, window_bounds = array<i64: 1, 4, 16, 16>}, {pipeline_mode = #tpu.pipeline_mode<synchronous>, transform_indices = @transform_1, window_bounds = array<i64: 4, 2>}, {pipeline_mode = #tpu.pipeline_mode<synchronous>, transform_indices = @transform_2, window_bounds = array<i64: 12, 4>}, {pipeline_mode = #tpu.pipeline_mode<synchronous>, transform_indices = @transform_3, window_bounds = array<i64: 4, 4>}, {pipeline_mode = #tpu.pipeline_mode<synchronous>, transform_indices = @transform_4, window_bounds = array<i64: 3, 4>}, {pipeline_mode = #tpu.pipeline_mode<synchronous>, transform_indices = @transform_5, window_bounds = array<i64: 3, 4>}, {transform_indices = @transform_6, window_bounds = array<i64: 1, 1, 16, 16>}]} {
    %cst = arith.constant 1.000000e+00 : bf16
    %0 = vector.broadcast %cst : bf16 to vector<16x1xbf16>
    %cst_0 = arith.constant 0.000000e+00 : f32
    %1 = vector.broadcast %cst_0 : f32 to vector<4x1xf32>
    %c0 = arith.constant 0 : index
    %c0_1 = arith.constant 0 : index
    %c0_2 = arith.constant 0 : index
    %c0_3 = arith.constant 0 : index
    %2 = vector.load %arg1[%c0, %c0_1, %c0_2, %c0_3] : memref<1x4x16x16xbf16, #tpu.memory_space<vmem>>, vector<1x4x1x16xbf16>
    %3 = vector.shape_cast %2 : vector<1x4x1x16xbf16> to vector<4x16xbf16>
    %cst_4 = arith.constant dense<0.000000e+00> : vector<4x1xf32>
    %4 = tpu.matmul %3, %0, %cst_4 {dimension_numbers = #tpu.dot_dimension_numbers<[1], [0], [0], [1], [0, 0, 1, 1], [], []>} : vector<4x16xbf16>, vector<16x1xbf16>, vector<4x1xf32> -> vector<4x1xf32>
    %5 = arith.addf %1, %4 : vector<4x1xf32>
    %c0_5 = arith.constant 0 : index
    %c0_6 = arith.constant 0 : index
    %c1 = arith.constant 1 : index
    %c0_7 = arith.constant 0 : index
    %6 = vector.load %arg1[%c0_5, %c0_6, %c1, %c0_7] : memref<1x4x16x16xbf16, #tpu.memory_space<vmem>>, vector<1x4x1x16xbf16>
    %7 = vector.shape_cast %6 : vector<1x4x1x16xbf16> to vector<4x16xbf16>
    %cst_8 = arith.constant dense<0.000000e+00> : vector<4x1xf32>
    %8 = tpu.matmul %7, %0, %cst_8 {dimension_numbers = #tpu.dot_dimension_numbers<[1], [0], [0], [1], [0, 0, 1, 1], [], []>} : vector<4x16xbf16>, vector<16x1xbf16>, vector<4x1xf32> -> vector<4x1xf32>
    %9 = arith.addf %5, %8 : vector<4x1xf32>
    %c0_9 = arith.constant 0 : index
    %c0_10 = arith.constant 0 : index
    %c2 = arith.constant 2 : index
    %c0_11 = arith.constant 0 : index
    %10 = vector.load %arg1[%c0_9, %c0_10, %c2, %c0_11] : memref<1x4x16x16xbf16, #tpu.memory_space<vmem>>, vector<1x4x1x16xbf16>
    %11 = vector.shape_cast %10 : vector<1x4x1x16xbf16> to vector<4x16xbf16>
    %cst_12 = arith.constant dense<0.000000e+00> : vector<4x1xf32>
    %12 = tpu.matmul %11, %0, %cst_12 {dimension_numbers = #tpu.dot_dimension_numbers<[1], [0], [0], [1], [0, 0, 1, 1], [], []>} : vector<4x16xbf16>, vector<16x1xbf16>, vector<4x1xf32> -> vector<4x1xf32>
    %13 = arith.addf %9, %12 : vector<4x1xf32>
    %c0_13 = arith.constant 0 : index
    %c0_14 = arith.constant 0 : index
    %c3 = arith.constant 3 : index
    %c0_15 = arith.constant 0 : index
    %14 = vector.load %arg1[%c0_13, %c0_14, %c3, %c0_15] : memref<1x4x16x16xbf16, #tpu.memory_space<vmem>>, vector<1x4x1x16xbf16>
    %15 = vector.shape_cast %14 : vector<1x4x1x16xbf16> to vector<4x16xbf16>
    %cst_16 = arith.constant dense<0.000000e+00> : vector<4x1xf32>
    %16 = tpu.matmul %15, %0, %cst_16 {dimension_numbers = #tpu.dot_dimension_numbers<[1], [0], [0], [1], [0, 0, 1, 1], [], []>} : vector<4x16xbf16>, vector<16x1xbf16>, vector<4x1xf32> -> vector<4x1xf32>
    %17 = arith.addf %13, %16 : vector<4x1xf32>
    %c0_17 = arith.constant 0 : index
    %c0_18 = arith.constant 0 : index
    %c4 = arith.constant 4 : index
    %c0_19 = arith.constant 0 : index
    %18 = vector.load %arg1[%c0_17, %c0_18, %c4, %c0_19] : memref<1x4x16x16xbf16, #tpu.memory_space<vmem>>, vector<1x4x1x16xbf16>
    %19 = vector.shape_cast %18 : vector<1x4x1x16xbf16> to vector<4x16xbf16>
    %cst_20 = arith.constant dense<0.000000e+00> : vector<4x1xf32>
    %20 = tpu.matmul %19, %0, %cst_20 {dimension_numbers = #tpu.dot_dimension_numbers<[1], [0], [0], [1], [0, 0, 1, 1], [], []>} : vector<4x16xbf16>, vector<16x1xbf16>, vector<4x1xf32> -> vector<4x1xf32>
    %21 = arith.addf %17, %20 : vector<4x1xf32>
    %c0_21 = arith.constant 0 : index
    %c0_22 = arith.constant 0 : index
    %c5 = arith.constant 5 : index
    %c0_23 = arith.constant 0 : index
    %22 = vector.load %arg1[%c0_21, %c0_22, %c5, %c0_23] : memref<1x4x16x16xbf16, #tpu.memory_space<vmem>>, vector<1x4x1x16xbf16>
    %23 = vector.shape_cast %22 : vector<1x4x1x16xbf16> to vector<4x16xbf16>
    %cst_24 = arith.constant dense<0.000000e+00> : vector<4x1xf32>
    %24 = tpu.matmul %23, %0, %cst_24 {dimension_numbers = #tpu.dot_dimension_numbers<[1], [0], [0], [1], [0, 0, 1, 1], [], []>} : vector<4x16xbf16>, vector<16x1xbf16>, vector<4x1xf32> -> vector<4x1xf32>
    %25 = arith.addf %21, %24 : vector<4x1xf32>
    %c0_25 = arith.constant 0 : index
    %c0_26 = arith.constant 0 : index
    %c6 = arith.constant 6 : index
    %c0_27 = arith.constant 0 : index
    %26 = vector.load %arg1[%c0_25, %c0_26, %c6, %c0_27] : memref<1x4x16x16xbf16, #tpu.memory_space<vmem>>, vector<1x4x1x16xbf16>
    %27 = vector.shape_cast %26 : vector<1x4x1x16xbf16> to vector<4x16xbf16>
    %cst_28 = arith.constant dense<0.000000e+00> : vector<4x1xf32>
    %28 = tpu.matmul %27, %0, %cst_28 {dimension_numbers = #tpu.dot_dimension_numbers<[1], [0], [0], [1], [0, 0, 1, 1], [], []>} : vector<4x16xbf16>, vector<16x1xbf16>, vector<4x1xf32> -> vector<4x1xf32>
    %29 = arith.addf %25, %28 : vector<4x1xf32>
    %c0_29 = arith.constant 0 : index
    %c0_30 = arith.constant 0 : index
    %c7 = arith.constant 7 : index
    %c0_31 = arith.constant 0 : index
    %30 = vector.load %arg1[%c0_29, %c0_30, %c7, %c0_31] : memref<1x4x16x16xbf16, #tpu.memory_space<vmem>>, vector<1x4x1x16xbf16>
    %31 = vector.shape_cast %30 : vector<1x4x1x16xbf16> to vector<4x16xbf16>
    %cst_32 = arith.constant dense<0.000000e+00> : vector<4x1xf32>
    %32 = tpu.matmul %31, %0, %cst_32 {dimension_numbers = #tpu.dot_dimension_numbers<[1], [0], [0], [1], [0, 0, 1, 1], [], []>} : vector<4x16xbf16>, vector<16x1xbf16>, vector<4x1xf32> -> vector<4x1xf32>
    %33 = arith.addf %29, %32 : vector<4x1xf32>
    %c0_33 = arith.constant 0 : index
    %c0_34 = arith.constant 0 : index
    %c8 = arith.constant 8 : index
    %c0_35 = arith.constant 0 : index
    %34 = vector.load %arg1[%c0_33, %c0_34, %c8, %c0_35] : memref<1x4x16x16xbf16, #tpu.memory_space<vmem>>, vector<1x4x1x16xbf16>
    %35 = vector.shape_cast %34 : vector<1x4x1x16xbf16> to vector<4x16xbf16>
    %cst_36 = arith.constant dense<0.000000e+00> : vector<4x1xf32>
    %36 = tpu.matmul %35, %0, %cst_36 {dimension_numbers = #tpu.dot_dimension_numbers<[1], [0], [0], [1], [0, 0, 1, 1], [], []>} : vector<4x16xbf16>, vector<16x1xbf16>, vector<4x1xf32> -> vector<4x1xf32>
    %37 = arith.addf %33, %36 : vector<4x1xf32>
    %c0_37 = arith.constant 0 : index
    %c0_38 = arith.constant 0 : index
    %c9 = arith.constant 9 : index
    %c0_39 = arith.constant 0 : index
    %38 = vector.load %arg1[%c0_37, %c0_38, %c9, %c0_39] : memref<1x4x16x16xbf16, #tpu.memory_space<vmem>>, vector<1x4x1x16xbf16>
    %39 = vector.shape_cast %38 : vector<1x4x1x16xbf16> to vector<4x16xbf16>
    %cst_40 = arith.constant dense<0.000000e+00> : vector<4x1xf32>
    %40 = tpu.matmul %39, %0, %cst_40 {dimension_numbers = #tpu.dot_dimension_numbers<[1], [0], [0], [1], [0, 0, 1, 1], [], []>} : vector<4x16xbf16>, vector<16x1xbf16>, vector<4x1xf32> -> vector<4x1xf32>
    %41 = arith.addf %37, %40 : vector<4x1xf32>
    %c0_41 = arith.constant 0 : index
    %c0_42 = arith.constant 0 : index
    %c10 = arith.constant 10 : index
    %c0_43 = arith.constant 0 : index
    %42 = vector.load %arg1[%c0_41, %c0_42, %c10, %c0_43] : memref<1x4x16x16xbf16, #tpu.memory_space<vmem>>, vector<1x4x1x16xbf16>
    %43 = vector.shape_cast %42 : vector<1x4x1x16xbf16> to vector<4x16xbf16>
    %cst_44 = arith.constant dense<0.000000e+00> : vector<4x1xf32>
    %44 = tpu.matmul %43, %0, %cst_44 {dimension_numbers = #tpu.dot_dimension_numbers<[1], [0], [0], [1], [0, 0, 1, 1], [], []>} : vector<4x16xbf16>, vector<16x1xbf16>, vector<4x1xf32> -> vector<4x1xf32>
    %45 = arith.addf %41, %44 : vector<4x1xf32>
    %c0_45 = arith.constant 0 : index
    %c0_46 = arith.constant 0 : index
    %c11 = arith.constant 11 : index
    %c0_47 = arith.constant 0 : index
    %46 = vector.load %arg1[%c0_45, %c0_46, %c11, %c0_47] : memref<1x4x16x16xbf16, #tpu.memory_space<vmem>>, vector<1x4x1x16xbf16>
    %47 = vector.shape_cast %46 : vector<1x4x1x16xbf16> to vector<4x16xbf16>
    %cst_48 = arith.constant dense<0.000000e+00> : vector<4x1xf32>
    %48 = tpu.matmul %47, %0, %cst_48 {dimension_numbers = #tpu.dot_dimension_numbers<[1], [0], [0], [1], [0, 0, 1, 1], [], []>} : vector<4x16xbf16>, vector<16x1xbf16>, vector<4x1xf32> -> vector<4x1xf32>
    %49 = arith.addf %45, %48 : vector<4x1xf32>
    %c0_49 = arith.constant 0 : index
    %c0_50 = arith.constant 0 : index
    %c12 = arith.constant 12 : index
    %c0_51 = arith.constant 0 : index
    %50 = vector.load %arg1[%c0_49, %c0_50, %c12, %c0_51] : memref<1x4x16x16xbf16, #tpu.memory_space<vmem>>, vector<1x4x1x16xbf16>
    %51 = vector.shape_cast %50 : vector<1x4x1x16xbf16> to vector<4x16xbf16>
    %cst_52 = arith.constant dense<0.000000e+00> : vector<4x1xf32>
    %52 = tpu.matmul %51, %0, %cst_52 {dimension_numbers = #tpu.dot_dimension_numbers<[1], [0], [0], [1], [0, 0, 1, 1], [], []>} : vector<4x16xbf16>, vector<16x1xbf16>, vector<4x1xf32> -> vector<4x1xf32>
    %53 = arith.addf %49, %52 : vector<4x1xf32>
    %c0_53 = arith.constant 0 : index
    %c0_54 = arith.constant 0 : index
    %c13 = arith.constant 13 : index
    %c0_55 = arith.constant 0 : index
    %54 = vector.load %arg1[%c0_53, %c0_54, %c13, %c0_55] : memref<1x4x16x16xbf16, #tpu.memory_space<vmem>>, vector<1x4x1x16xbf16>
    %55 = vector.shape_cast %54 : vector<1x4x1x16xbf16> to vector<4x16xbf16>
    %cst_56 = arith.constant dense<0.000000e+00> : vector<4x1xf32>
    %56 = tpu.matmul %55, %0, %cst_56 {dimension_numbers = #tpu.dot_dimension_numbers<[1], [0], [0], [1], [0, 0, 1, 1], [], []>} : vector<4x16xbf16>, vector<16x1xbf16>, vector<4x1xf32> -> vector<4x1xf32>
    %57 = arith.addf %53, %56 : vector<4x1xf32>
    %c0_57 = arith.constant 0 : index
    %c0_58 = arith.constant 0 : index
    %c14 = arith.constant 14 : index
    %c0_59 = arith.constant 0 : index
    %58 = vector.load %arg1[%c0_57, %c0_58, %c14, %c0_59] : memref<1x4x16x16xbf16, #tpu.memory_space<vmem>>, vector<1x4x1x16xbf16>
    %59 = vector.shape_cast %58 : vector<1x4x1x16xbf16> to vector<4x16xbf16>
    %cst_60 = arith.constant dense<0.000000e+00> : vector<4x1xf32>
    %60 = tpu.matmul %59, %0, %cst_60 {dimension_numbers = #tpu.dot_dimension_numbers<[1], [0], [0], [1], [0, 0, 1, 1], [], []>} : vector<4x16xbf16>, vector<16x1xbf16>, vector<4x1xf32> -> vector<4x1xf32>
    %61 = arith.addf %57, %60 : vector<4x1xf32>
    %c0_61 = arith.constant 0 : index
    %c0_62 = arith.constant 0 : index
    %c15 = arith.constant 15 : index
    %c0_63 = arith.constant 0 : index
    %62 = vector.load %arg1[%c0_61, %c0_62, %c15, %c0_63] : memref<1x4x16x16xbf16, #tpu.memory_space<vmem>>, vector<1x4x1x16xbf16>
    %63 = vector.shape_cast %62 : vector<1x4x1x16xbf16> to vector<4x16xbf16>
    %cst_64 = arith.constant dense<0.000000e+00> : vector<4x1xf32>
    %64 = tpu.matmul %63, %0, %cst_64 {dimension_numbers = #tpu.dot_dimension_numbers<[1], [0], [0], [1], [0, 0, 1, 1], [], []>} : vector<4x16xbf16>, vector<16x1xbf16>, vector<4x1xf32> -> vector<4x1xf32>
    %65 = arith.addf %61, %64 : vector<4x1xf32>
    %cst_65 = arith.constant 3.906250e-03 : f32
    %66 = vector.broadcast %cst_65 : f32 to vector<4x1xf32>
    %67 = arith.mulf %65, %66 : vector<4x1xf32>
    %c0_66 = arith.constant 0 : index
    %c0_67 = arith.constant 0 : index
    %68 = vector.load %arg2[%c0_66, %c0_67] : memref<4x2xf32, #tpu.memory_space<vmem>>, vector<4x1xf32>
    %c0_68 = arith.constant 0 : index
    %c1_69 = arith.constant 1 : index
    %69 = vector.load %arg2[%c0_68, %c1_69] : memref<4x2xf32, #tpu.memory_space<vmem>>, vector<4x1xf32>
    %70 = arith.mulf %67, %68 : vector<4x1xf32>
    %71 = arith.addf %70, %69 : vector<4x1xf32>
    %c0_70 = arith.constant 0 : index
    %c0_71 = arith.constant 0 : index
    %72 = vector.load %arg3[%c0_70, %c0_71] : memref<12x4xf32, #tpu.memory_space<vmem>>, vector<12x4xf32>
    %cst_72 = arith.constant dense<0.000000e+00> : vector<12x1xf32>
    %73 = tpu.matmul %72, %71, %cst_72 {dimension_numbers = #tpu.dot_dimension_numbers<[1], [0], [0], [1], [0, 0, 1, 1], [], []>} : vector<12x4xf32>, vector<4x1xf32>, vector<12x1xf32> -> vector<12x1xf32>
    %74 = vector.extract_strided_slice %73 {offsets = [0, 0], sizes = [4, 1], strides = [1, 1]} : vector<12x1xf32> to vector<4x1xf32>
    %75 = vector.extract_strided_slice %73 {offsets = [4, 0], sizes = [4, 1], strides = [1, 1]} : vector<12x1xf32> to vector<4x1xf32>
    %76 = vector.extract_strided_slice %73 {offsets = [8, 0], sizes = [4, 1], strides = [1, 1]} : vector<12x1xf32> to vector<4x1xf32>
    %cst_73 = arith.constant dense<0.000000e+00> : vector<4x4xf32>
    %77 = tpu.matmul %74, %75, %cst_73 {dimension_numbers = #tpu.dot_dimension_numbers<[1], [1], [0], [0], [0, 0, 1, 0], [], []>} : vector<4x1xf32>, vector<4x1xf32>, vector<4x4xf32> -> vector<4x4xf32>
    %cst_74 = arith.constant dense<0xFF800000> : vector<4xf32>
    %78 = vector.multi_reduction <maximumf>, %77, %cst_74 [1] : vector<4x4xf32> to vector<4xf32>
    %79 = vector.shape_cast %78 : vector<4xf32> to vector<4x1xf32>
    %80 = vector.broadcast %79 : vector<4x1xf32> to vector<4x4xf32>
    %81 = arith.subf %77, %80 : vector<4x4xf32>
    %82 = math.exp %81 : vector<4x4xf32>
    %cst_75 = arith.constant dense<0.000000e+00> : vector<4xf32>
    %83 = vector.multi_reduction <add>, %82, %cst_75 [1] : vector<4x4xf32> to vector<4xf32>
    %84 = vector.shape_cast %83 : vector<4xf32> to vector<4x1xf32>
    %85 = vector.broadcast %84 : vector<4x1xf32> to vector<4x4xf32>
    %86 = arith.divf %82, %85 : vector<4x4xf32>
    %cst_76 = arith.constant dense<0.000000e+00> : vector<4x1xf32>
    %87 = tpu.matmul %86, %76, %cst_76 {dimension_numbers = #tpu.dot_dimension_numbers<[1], [0], [0], [1], [0, 0, 1, 1], [], []>} : vector<4x4xf32>, vector<4x1xf32>, vector<4x1xf32> -> vector<4x1xf32>
    %c0_77 = arith.constant 0 : index
    %c0_78 = arith.constant 0 : index
    %88 = vector.load %arg4[%c0_77, %c0_78] : memref<4x4xf32, #tpu.memory_space<vmem>>, vector<4x4xf32>
    %cst_79 = arith.constant dense<0.000000e+00> : vector<4x1xf32>
    %89 = tpu.matmul %88, %87, %cst_79 {dimension_numbers = #tpu.dot_dimension_numbers<[1], [0], [0], [1], [0, 0, 1, 1], [], []>} : vector<4x4xf32>, vector<4x1xf32>, vector<4x1xf32> -> vector<4x1xf32>
    %cst_80 = arith.constant 0.000000e+00 : f32
    %90 = vector.broadcast %cst_80 : f32 to vector<4x1xf32>
    %91 = arith.subf %90, %89 : vector<4x1xf32>
    %92 = math.exp %91 : vector<4x1xf32>
    %cst_81 = arith.constant 1.000000e+00 : f32
    %93 = vector.broadcast %cst_81 : f32 to vector<4x1xf32>
    %94 = arith.addf %93, %92 : vector<4x1xf32>
    %cst_82 = arith.constant 1.000000e+00 : f32
    %95 = vector.broadcast %cst_82 : f32 to vector<4x1xf32>
    %96 = arith.divf %95, %94 : vector<4x1xf32>
    %cst_83 = arith.constant 1.000000e+00 : f32
    %97 = vector.broadcast %cst_83 : f32 to vector<1x1xf32>
    %cst_84 = arith.constant dense<0.000000e+00> : vector<1x4xf32>
    %98 = tpu.matmul %97, %96, %cst_84 {dimension_numbers = #tpu.dot_dimension_numbers<[1], [1], [0], [0], [0, 0, 1, 0], [], []>} : vector<1x1xf32>, vector<4x1xf32>, vector<1x4xf32> -> vector<1x4xf32>
    %99 = tpu.iota {dimensions = array<i32: 0>} : vector<4x4xi32>
    %100 = tpu.iota {dimensions = array<i32: 1>} : vector<4x4xi32>
    %101 = arith.cmpi eq, %99, %100 : vector<4x4xi32>
    %102 = vector.broadcast %98 : vector<1x4xf32> to vector<4x4xf32>
    %103 = vector.broadcast %96 : vector<4x1xf32> to vector<4x4xf32>
    %104 = arith.cmpf ole, %102, %103 : vector<4x4xf32>
    %105 = arith.ori %101, %104 : vector<4x4xi1>
    %cst_85 = arith.constant 1.000000e+00 : f32
    %cst_86 = arith.constant 0.000000e+00 : f32
    %106 = vector.broadcast %cst_85 : f32 to vector<4x4xf32>
    %107 = vector.broadcast %cst_86 : f32 to vector<4x4xf32>
    %108 = arith.select %105, %106, %107 : vector<4x4xi1>, vector<4x4xf32>
    %cst_87 = arith.constant dense<0.000000e+00> : vector<4xf32>
    %109 = vector.multi_reduction <add>, %108, %cst_87 [1] : vector<4x4xf32> to vector<4xf32>
    %110 = vector.shape_cast %109 : vector<4xf32> to vector<4x1xf32>
    %cst_88 = arith.constant 1.000000e+00 : f32
    %111 = vector.broadcast %cst_88 : f32 to vector<4x1xf32>
    %112 = arith.cmpf oge, %110, %111 : vector<4x1xf32>
    %cst_89 = arith.constant 0x7F800000 : f32
    %113 = vector.broadcast %cst_89 : f32 to vector<4x1xf32>
    %114 = arith.select %112, %96, %113 : vector<4x1xi1>, vector<4x1xf32>
    %cst_90 = arith.constant dense<0x7F800000> : vector<1xf32>
    %115 = vector.multi_reduction <minimumf>, %114, %cst_90 [0] : vector<4x1xf32> to vector<1xf32>
    %116 = vector.shape_cast %115 : vector<1xf32> to vector<1x1xf32>
    %cst_91 = arith.constant 2.000000e+00 : f32
    %117 = vector.broadcast %cst_91 : f32 to vector<4x1xf32>
    %118 = arith.cmpf oge, %110, %117 : vector<4x1xf32>
    %cst_92 = arith.constant 0x7F800000 : f32
    %119 = vector.broadcast %cst_92 : f32 to vector<4x1xf32>
    %120 = arith.select %118, %96, %119 : vector<4x1xi1>, vector<4x1xf32>
    %cst_93 = arith.constant dense<0x7F800000> : vector<1xf32>
    %121 = vector.multi_reduction <minimumf>, %120, %cst_93 [0] : vector<4x1xf32> to vector<1xf32>
    %122 = vector.shape_cast %121 : vector<1xf32> to vector<1x1xf32>
    %123 = arith.subf %122, %116 : vector<1x1xf32>
    %cst_94 = arith.constant 3.000000e-01 : f32
    %124 = vector.broadcast %cst_94 : f32 to vector<1x1xf32>
    %125 = arith.mulf %124, %123 : vector<1x1xf32>
    %126 = arith.addf %116, %125 : vector<1x1xf32>
    %127 = vector.broadcast %126 : vector<1x1xf32> to vector<4x1xf32>
    %128 = arith.cmpf ole, %96, %127 : vector<4x1xf32>
    %cst_95 = arith.constant 0.000000e+00 : f32
    %129 = vector.broadcast %cst_95 : f32 to vector<4x1xf32>
    %130 = arith.select %128, %129, %96 : vector<4x1xi1>, vector<4x1xf32>
    %cst_96 = arith.constant 1.000000e+00 : f32
    %131 = vector.broadcast %cst_96 : f32 to vector<4x1xf32>
    %132 = arith.addf %131, %96 : vector<4x1xf32>
    %133 = arith.mulf %132, %130 : vector<4x1xf32>
    %cst_97 = arith.constant dense<0.000000e+00> : vector<1x4xf32>
    %134 = tpu.matmul %97, %133, %cst_97 {dimension_numbers = #tpu.dot_dimension_numbers<[1], [1], [0], [0], [0, 0, 1, 0], [], []>} : vector<1x1xf32>, vector<4x1xf32>, vector<1x4xf32> -> vector<1x4xf32>
    %c0_98 = arith.constant 0 : index
    %c0_99 = arith.constant 0 : index
    %135 = vector.load %arg5[%c0_98, %c0_99] : memref<3x4xf32, #tpu.memory_space<vmem>>, vector<3x4xf32>
    %136 = vector.broadcast %134 : vector<1x4xf32> to vector<3x4xf32>
    %137 = arith.mulf %135, %136 : vector<3x4xf32>
    %138 = arith.truncf %137 : vector<3x4xf32> to vector<3x4xbf16>
    %c0_100 = arith.constant 0 : index
    %c0_101 = arith.constant 0 : index
    %139 = vector.load %arg6[%c0_100, %c0_101] : memref<3x4xf32, #tpu.memory_space<vmem>>, vector<3x4xf32>
    %cst_102 = arith.constant dense<0.000000e+00> : vector<3x1xf32>
    %140 = tpu.matmul %139, %130, %cst_102 {dimension_numbers = #tpu.dot_dimension_numbers<[1], [0], [0], [1], [0, 0, 1, 1], [], []>} : vector<3x4xf32>, vector<4x1xf32>, vector<3x1xf32> -> vector<3x1xf32>
    %c0_103 = arith.constant 0 : index
    %c0_104 = arith.constant 0 : index
    %c0_105 = arith.constant 0 : index
    %c0_106 = arith.constant 0 : index
    %141 = vector.load %arg1[%c0_103, %c0_104, %c0_105, %c0_106] : memref<1x4x16x16xbf16, #tpu.memory_space<vmem>>, vector<1x4x1x16xbf16>
    %142 = vector.shape_cast %141 : vector<1x4x1x16xbf16> to vector<4x16xbf16>
    %cst_107 = arith.constant dense<0.000000e+00> : vector<3x16xf32>
    %143 = tpu.matmul %138, %142, %cst_107 {dimension_numbers = #tpu.dot_dimension_numbers<[1], [0], [0], [1], [0, 0, 1, 1], [], []>} : vector<3x4xbf16>, vector<4x16xbf16>, vector<3x16xf32> -> vector<3x16xf32>
    %144 = vector.broadcast %140 : vector<3x1xf32> to vector<3x16xf32>
    %145 = arith.addf %143, %144 : vector<3x16xf32>
    %c0_108 = arith.constant 0 : index
    %c0_109 = arith.constant 0 : index
    %c0_110 = arith.constant 0 : index
    %146 = vector.load %arg8[%c0_108, %c0_109, %c0_110] : memref<16x3x16xf32, #tpu.memory_space<vmem>>, vector<1x3x16xf32>
    %147 = vector.shape_cast %146 : vector<1x3x16xf32> to vector<3x16xf32>
    %148 = vector.shape_cast %145 : vector<3x16xf32> to vector<1x3x16xf32>
    tpu.vector_store %arg8[%c0_108, %c0_109, %c0_110], %148 {strides = array<i32>} : memref<16x3x16xf32, #tpu.memory_space<vmem>>, vector<1x3x16xf32>,
    %c0_111 = arith.constant 0 : index
    %c0_112 = arith.constant 0 : index
    %c1_113 = arith.constant 1 : index
    %c0_114 = arith.constant 0 : index
    %149 = vector.load %arg1[%c0_111, %c0_112, %c1_113, %c0_114] : memref<1x4x16x16xbf16, #tpu.memory_space<vmem>>, vector<1x4x1x16xbf16>
    %150 = vector.shape_cast %149 : vector<1x4x1x16xbf16> to vector<4x16xbf16>
    %cst_115 = arith.constant dense<0.000000e+00> : vector<3x16xf32>
    %151 = tpu.matmul %138, %150, %cst_115 {dimension_numbers = #tpu.dot_dimension_numbers<[1], [0], [0], [1], [0, 0, 1, 1], [], []>} : vector<3x4xbf16>, vector<4x16xbf16>, vector<3x16xf32> -> vector<3x16xf32>
    %152 = vector.broadcast %140 : vector<3x1xf32> to vector<3x16xf32>
    %153 = arith.addf %151, %152 : vector<3x16xf32>
    %c1_116 = arith.constant 1 : index
    %c0_117 = arith.constant 0 : index
    %c0_118 = arith.constant 0 : index
    %154 = vector.load %arg8[%c1_116, %c0_117, %c0_118] : memref<16x3x16xf32, #tpu.memory_space<vmem>>, vector<1x3x16xf32>
    %155 = vector.shape_cast %154 : vector<1x3x16xf32> to vector<3x16xf32>
    %156 = vector.shape_cast %153 : vector<3x16xf32> to vector<1x3x16xf32>
    tpu.vector_store %arg8[%c1_116, %c0_117, %c0_118], %156 {strides = array<i32>} : memref<16x3x16xf32, #tpu.memory_space<vmem>>, vector<1x3x16xf32>,
    %c0_119 = arith.constant 0 : index
    %c0_120 = arith.constant 0 : index
    %c2_121 = arith.constant 2 : index
    %c0_122 = arith.constant 0 : index
    %157 = vector.load %arg1[%c0_119, %c0_120, %c2_121, %c0_122] : memref<1x4x16x16xbf16, #tpu.memory_space<vmem>>, vector<1x4x1x16xbf16>
    %158 = vector.shape_cast %157 : vector<1x4x1x16xbf16> to vector<4x16xbf16>
    %cst_123 = arith.constant dense<0.000000e+00> : vector<3x16xf32>
    %159 = tpu.matmul %138, %158, %cst_123 {dimension_numbers = #tpu.dot_dimension_numbers<[1], [0], [0], [1], [0, 0, 1, 1], [], []>} : vector<3x4xbf16>, vector<4x16xbf16>, vector<3x16xf32> -> vector<3x16xf32>
    %160 = vector.broadcast %140 : vector<3x1xf32> to vector<3x16xf32>
    %161 = arith.addf %159, %160 : vector<3x16xf32>
    %c2_124 = arith.constant 2 : index
    %c0_125 = arith.constant 0 : index
    %c0_126 = arith.constant 0 : index
    %162 = vector.load %arg8[%c2_124, %c0_125, %c0_126] : memref<16x3x16xf32, #tpu.memory_space<vmem>>, vector<1x3x16xf32>
    %163 = vector.shape_cast %162 : vector<1x3x16xf32> to vector<3x16xf32>
    %164 = vector.shape_cast %161 : vector<3x16xf32> to vector<1x3x16xf32>
    tpu.vector_store %arg8[%c2_124, %c0_125, %c0_126], %164 {strides = array<i32>} : memref<16x3x16xf32, #tpu.memory_space<vmem>>, vector<1x3x16xf32>,
    %c0_127 = arith.constant 0 : index
    %c0_128 = arith.constant 0 : index
    %c3_129 = arith.constant 3 : index
    %c0_130 = arith.constant 0 : index
    %165 = vector.load %arg1[%c0_127, %c0_128, %c3_129, %c0_130] : memref<1x4x16x16xbf16, #tpu.memory_space<vmem>>, vector<1x4x1x16xbf16>
    %166 = vector.shape_cast %165 : vector<1x4x1x16xbf16> to vector<4x16xbf16>
    %cst_131 = arith.constant dense<0.000000e+00> : vector<3x16xf32>
    %167 = tpu.matmul %138, %166, %cst_131 {dimension_numbers = #tpu.dot_dimension_numbers<[1], [0], [0], [1], [0, 0, 1, 1], [], []>} : vector<3x4xbf16>, vector<4x16xbf16>, vector<3x16xf32> -> vector<3x16xf32>
    %168 = vector.broadcast %140 : vector<3x1xf32> to vector<3x16xf32>
    %169 = arith.addf %167, %168 : vector<3x16xf32>
    %c3_132 = arith.constant 3 : index
    %c0_133 = arith.constant 0 : index
    %c0_134 = arith.constant 0 : index
    %170 = vector.load %arg8[%c3_132, %c0_133, %c0_134] : memref<16x3x16xf32, #tpu.memory_space<vmem>>, vector<1x3x16xf32>
    %171 = vector.shape_cast %170 : vector<1x3x16xf32> to vector<3x16xf32>
    %172 = vector.shape_cast %169 : vector<3x16xf32> to vector<1x3x16xf32>
    tpu.vector_store %arg8[%c3_132, %c0_133, %c0_134], %172 {strides = array<i32>} : memref<16x3x16xf32, #tpu.memory_space<vmem>>, vector<1x3x16xf32>,
    %c0_135 = arith.constant 0 : index
    %c0_136 = arith.constant 0 : index
    %c4_137 = arith.constant 4 : index
    %c0_138 = arith.constant 0 : index
    %173 = vector.load %arg1[%c0_135, %c0_136, %c4_137, %c0_138] : memref<1x4x16x16xbf16, #tpu.memory_space<vmem>>, vector<1x4x1x16xbf16>
    %174 = vector.shape_cast %173 : vector<1x4x1x16xbf16> to vector<4x16xbf16>
    %cst_139 = arith.constant dense<0.000000e+00> : vector<3x16xf32>
    %175 = tpu.matmul %138, %174, %cst_139 {dimension_numbers = #tpu.dot_dimension_numbers<[1], [0], [0], [1], [0, 0, 1, 1], [], []>} : vector<3x4xbf16>, vector<4x16xbf16>, vector<3x16xf32> -> vector<3x16xf32>
    %176 = vector.broadcast %140 : vector<3x1xf32> to vector<3x16xf32>
    %177 = arith.addf %175, %176 : vector<3x16xf32>
    %c4_140 = arith.constant 4 : index
    %c0_141 = arith.constant 0 : index
    %c0_142 = arith.constant 0 : index
    %178 = vector.load %arg8[%c4_140, %c0_141, %c0_142] : memref<16x3x16xf32, #tpu.memory_space<vmem>>, vector<1x3x16xf32>
    %179 = vector.shape_cast %178 : vector<1x3x16xf32> to vector<3x16xf32>
    %180 = vector.shape_cast %177 : vector<3x16xf32> to vector<1x3x16xf32>
    tpu.vector_store %arg8[%c4_140, %c0_141, %c0_142], %180 {strides = array<i32>} : memref<16x3x16xf32, #tpu.memory_space<vmem>>, vector<1x3x16xf32>,
    %c0_143 = arith.constant 0 : index
    %c0_144 = arith.constant 0 : index
    %c5_145 = arith.constant 5 : index
    %c0_146 = arith.constant 0 : index
    %181 = vector.load %arg1[%c0_143, %c0_144, %c5_145, %c0_146] : memref<1x4x16x16xbf16, #tpu.memory_space<vmem>>, vector<1x4x1x16xbf16>
    %182 = vector.shape_cast %181 : vector<1x4x1x16xbf16> to vector<4x16xbf16>
    %cst_147 = arith.constant dense<0.000000e+00> : vector<3x16xf32>
    %183 = tpu.matmul %138, %182, %cst_147 {dimension_numbers = #tpu.dot_dimension_numbers<[1], [0], [0], [1], [0, 0, 1, 1], [], []>} : vector<3x4xbf16>, vector<4x16xbf16>, vector<3x16xf32> -> vector<3x16xf32>
    %184 = vector.broadcast %140 : vector<3x1xf32> to vector<3x16xf32>
    %185 = arith.addf %183, %184 : vector<3x16xf32>
    %c5_148 = arith.constant 5 : index
    %c0_149 = arith.constant 0 : index
    %c0_150 = arith.constant 0 : index
    %186 = vector.load %arg8[%c5_148, %c0_149, %c0_150] : memref<16x3x16xf32, #tpu.memory_space<vmem>>, vector<1x3x16xf32>
    %187 = vector.shape_cast %186 : vector<1x3x16xf32> to vector<3x16xf32>
    %188 = vector.shape_cast %185 : vector<3x16xf32> to vector<1x3x16xf32>
    tpu.vector_store %arg8[%c5_148, %c0_149, %c0_150], %188 {strides = array<i32>} : memref<16x3x16xf32, #tpu.memory_space<vmem>>, vector<1x3x16xf32>,
    %c0_151 = arith.constant 0 : index
    %c0_152 = arith.constant 0 : index
    %c6_153 = arith.constant 6 : index
    %c0_154 = arith.constant 0 : index
    %189 = vector.load %arg1[%c0_151, %c0_152, %c6_153, %c0_154] : memref<1x4x16x16xbf16, #tpu.memory_space<vmem>>, vector<1x4x1x16xbf16>
    %190 = vector.shape_cast %189 : vector<1x4x1x16xbf16> to vector<4x16xbf16>
    %cst_155 = arith.constant dense<0.000000e+00> : vector<3x16xf32>
    %191 = tpu.matmul %138, %190, %cst_155 {dimension_numbers = #tpu.dot_dimension_numbers<[1], [0], [0], [1], [0, 0, 1, 1], [], []>} : vector<3x4xbf16>, vector<4x16xbf16>, vector<3x16xf32> -> vector<3x16xf32>
    %192 = vector.broadcast %140 : vector<3x1xf32> to vector<3x16xf32>
    %193 = arith.addf %191, %192 : vector<3x16xf32>
    %c6_156 = arith.constant 6 : index
    %c0_157 = arith.constant 0 : index
    %c0_158 = arith.constant 0 : index
    %194 = vector.load %arg8[%c6_156, %c0_157, %c0_158] : memref<16x3x16xf32, #tpu.memory_space<vmem>>, vector<1x3x16xf32>
    %195 = vector.shape_cast %194 : vector<1x3x16xf32> to vector<3x16xf32>
    %196 = vector.shape_cast %193 : vector<3x16xf32> to vector<1x3x16xf32>
    tpu.vector_store %arg8[%c6_156, %c0_157, %c0_158], %196 {strides = array<i32>} : memref<16x3x16xf32, #tpu.memory_space<vmem>>, vector<1x3x16xf32>,
    %c0_159 = arith.constant 0 : index
    %c0_160 = arith.constant 0 : index
    %c7_161 = arith.constant 7 : index
    %c0_162 = arith.constant 0 : index
    %197 = vector.load %arg1[%c0_159, %c0_160, %c7_161, %c0_162] : memref<1x4x16x16xbf16, #tpu.memory_space<vmem>>, vector<1x4x1x16xbf16>
    %198 = vector.shape_cast %197 : vector<1x4x1x16xbf16> to vector<4x16xbf16>
    %cst_163 = arith.constant dense<0.000000e+00> : vector<3x16xf32>
    %199 = tpu.matmul %138, %198, %cst_163 {dimension_numbers = #tpu.dot_dimension_numbers<[1], [0], [0], [1], [0, 0, 1, 1], [], []>} : vector<3x4xbf16>, vector<4x16xbf16>, vector<3x16xf32> -> vector<3x16xf32>
    %200 = vector.broadcast %140 : vector<3x1xf32> to vector<3x16xf32>
    %201 = arith.addf %199, %200 : vector<3x16xf32>
    %c7_164 = arith.constant 7 : index
    %c0_165 = arith.constant 0 : index
    %c0_166 = arith.constant 0 : index
    %202 = vector.load %arg8[%c7_164, %c0_165, %c0_166] : memref<16x3x16xf32, #tpu.memory_space<vmem>>, vector<1x3x16xf32>
    %203 = vector.shape_cast %202 : vector<1x3x16xf32> to vector<3x16xf32>
    %204 = vector.shape_cast %201 : vector<3x16xf32> to vector<1x3x16xf32>
    tpu.vector_store %arg8[%c7_164, %c0_165, %c0_166], %204 {strides = array<i32>} : memref<16x3x16xf32, #tpu.memory_space<vmem>>, vector<1x3x16xf32>,
    %c0_167 = arith.constant 0 : index
    %c0_168 = arith.constant 0 : index
    %c8_169 = arith.constant 8 : index
    %c0_170 = arith.constant 0 : index
    %205 = vector.load %arg1[%c0_167, %c0_168, %c8_169, %c0_170] : memref<1x4x16x16xbf16, #tpu.memory_space<vmem>>, vector<1x4x1x16xbf16>
    %206 = vector.shape_cast %205 : vector<1x4x1x16xbf16> to vector<4x16xbf16>
    %cst_171 = arith.constant dense<0.000000e+00> : vector<3x16xf32>
    %207 = tpu.matmul %138, %206, %cst_171 {dimension_numbers = #tpu.dot_dimension_numbers<[1], [0], [0], [1], [0, 0, 1, 1], [], []>} : vector<3x4xbf16>, vector<4x16xbf16>, vector<3x16xf32> -> vector<3x16xf32>
    %208 = vector.broadcast %140 : vector<3x1xf32> to vector<3x16xf32>
    %209 = arith.addf %207, %208 : vector<3x16xf32>
    %c8_172 = arith.constant 8 : index
    %c0_173 = arith.constant 0 : index
    %c0_174 = arith.constant 0 : index
    %210 = vector.load %arg8[%c8_172, %c0_173, %c0_174] : memref<16x3x16xf32, #tpu.memory_space<vmem>>, vector<1x3x16xf32>
    %211 = vector.shape_cast %210 : vector<1x3x16xf32> to vector<3x16xf32>
    %212 = vector.shape_cast %209 : vector<3x16xf32> to vector<1x3x16xf32>
    tpu.vector_store %arg8[%c8_172, %c0_173, %c0_174], %212 {strides = array<i32>} : memref<16x3x16xf32, #tpu.memory_space<vmem>>, vector<1x3x16xf32>,
    %c0_175 = arith.constant 0 : index
    %c0_176 = arith.constant 0 : index
    %c9_177 = arith.constant 9 : index
    %c0_178 = arith.constant 0 : index
    %213 = vector.load %arg1[%c0_175, %c0_176, %c9_177, %c0_178] : memref<1x4x16x16xbf16, #tpu.memory_space<vmem>>, vector<1x4x1x16xbf16>
    %214 = vector.shape_cast %213 : vector<1x4x1x16xbf16> to vector<4x16xbf16>
    %cst_179 = arith.constant dense<0.000000e+00> : vector<3x16xf32>
    %215 = tpu.matmul %138, %214, %cst_179 {dimension_numbers = #tpu.dot_dimension_numbers<[1], [0], [0], [1], [0, 0, 1, 1], [], []>} : vector<3x4xbf16>, vector<4x16xbf16>, vector<3x16xf32> -> vector<3x16xf32>
    %216 = vector.broadcast %140 : vector<3x1xf32> to vector<3x16xf32>
    %217 = arith.addf %215, %216 : vector<3x16xf32>
    %c9_180 = arith.constant 9 : index
    %c0_181 = arith.constant 0 : index
    %c0_182 = arith.constant 0 : index
    %218 = vector.load %arg8[%c9_180, %c0_181, %c0_182] : memref<16x3x16xf32, #tpu.memory_space<vmem>>, vector<1x3x16xf32>
    %219 = vector.shape_cast %218 : vector<1x3x16xf32> to vector<3x16xf32>
    %220 = vector.shape_cast %217 : vector<3x16xf32> to vector<1x3x16xf32>
    tpu.vector_store %arg8[%c9_180, %c0_181, %c0_182], %220 {strides = array<i32>} : memref<16x3x16xf32, #tpu.memory_space<vmem>>, vector<1x3x16xf32>,
    %c0_183 = arith.constant 0 : index
    %c0_184 = arith.constant 0 : index
    %c10_185 = arith.constant 10 : index
    %c0_186 = arith.constant 0 : index
    %221 = vector.load %arg1[%c0_183, %c0_184, %c10_185, %c0_186] : memref<1x4x16x16xbf16, #tpu.memory_space<vmem>>, vector<1x4x1x16xbf16>
    %222 = vector.shape_cast %221 : vector<1x4x1x16xbf16> to vector<4x16xbf16>
    %cst_187 = arith.constant dense<0.000000e+00> : vector<3x16xf32>
    %223 = tpu.matmul %138, %222, %cst_187 {dimension_numbers = #tpu.dot_dimension_numbers<[1], [0], [0], [1], [0, 0, 1, 1], [], []>} : vector<3x4xbf16>, vector<4x16xbf16>, vector<3x16xf32> -> vector<3x16xf32>
    %224 = vector.broadcast %140 : vector<3x1xf32> to vector<3x16xf32>
    %225 = arith.addf %223, %224 : vector<3x16xf32>
    %c10_188 = arith.constant 10 : index
    %c0_189 = arith.constant 0 : index
    %c0_190 = arith.constant 0 : index
    %226 = vector.load %arg8[%c10_188, %c0_189, %c0_190] : memref<16x3x16xf32, #tpu.memory_space<vmem>>, vector<1x3x16xf32>
    %227 = vector.shape_cast %226 : vector<1x3x16xf32> to vector<3x16xf32>
    %228 = vector.shape_cast %225 : vector<3x16xf32> to vector<1x3x16xf32>
    tpu.vector_store %arg8[%c10_188, %c0_189, %c0_190], %228 {strides = array<i32>} : memref<16x3x16xf32, #tpu.memory_space<vmem>>, vector<1x3x16xf32>,
    %c0_191 = arith.constant 0 : index
    %c0_192 = arith.constant 0 : index
    %c11_193 = arith.constant 11 : index
    %c0_194 = arith.constant 0 : index
    %229 = vector.load %arg1[%c0_191, %c0_192, %c11_193, %c0_194] : memref<1x4x16x16xbf16, #tpu.memory_space<vmem>>, vector<1x4x1x16xbf16>
    %230 = vector.shape_cast %229 : vector<1x4x1x16xbf16> to vector<4x16xbf16>
    %cst_195 = arith.constant dense<0.000000e+00> : vector<3x16xf32>
    %231 = tpu.matmul %138, %230, %cst_195 {dimension_numbers = #tpu.dot_dimension_numbers<[1], [0], [0], [1], [0, 0, 1, 1], [], []>} : vector<3x4xbf16>, vector<4x16xbf16>, vector<3x16xf32> -> vector<3x16xf32>
    %232 = vector.broadcast %140 : vector<3x1xf32> to vector<3x16xf32>
    %233 = arith.addf %231, %232 : vector<3x16xf32>
    %c11_196 = arith.constant 11 : index
    %c0_197 = arith.constant 0 : index
    %c0_198 = arith.constant 0 : index
    %234 = vector.load %arg8[%c11_196, %c0_197, %c0_198] : memref<16x3x16xf32, #tpu.memory_space<vmem>>, vector<1x3x16xf32>
    %235 = vector.shape_cast %234 : vector<1x3x16xf32> to vector<3x16xf32>
    %236 = vector.shape_cast %233 : vector<3x16xf32> to vector<1x3x16xf32>
    tpu.vector_store %arg8[%c11_196, %c0_197, %c0_198], %236 {strides = array<i32>} : memref<16x3x16xf32, #tpu.memory_space<vmem>>, vector<1x3x16xf32>,
    %c0_199 = arith.constant 0 : index
    %c0_200 = arith.constant 0 : index
    %c12_201 = arith.constant 12 : index
    %c0_202 = arith.constant 0 : index
    %237 = vector.load %arg1[%c0_199, %c0_200, %c12_201, %c0_202] : memref<1x4x16x16xbf16, #tpu.memory_space<vmem>>, vector<1x4x1x16xbf16>
    %238 = vector.shape_cast %237 : vector<1x4x1x16xbf16> to vector<4x16xbf16>
    %cst_203 = arith.constant dense<0.000000e+00> : vector<3x16xf32>
    %239 = tpu.matmul %138, %238, %cst_203 {dimension_numbers = #tpu.dot_dimension_numbers<[1], [0], [0], [1], [0, 0, 1, 1], [], []>} : vector<3x4xbf16>, vector<4x16xbf16>, vector<3x16xf32> -> vector<3x16xf32>
    %240 = vector.broadcast %140 : vector<3x1xf32> to vector<3x16xf32>
    %241 = arith.addf %239, %240 : vector<3x16xf32>
    %c12_204 = arith.constant 12 : index
    %c0_205 = arith.constant 0 : index
    %c0_206 = arith.constant 0 : index
    %242 = vector.load %arg8[%c12_204, %c0_205, %c0_206] : memref<16x3x16xf32, #tpu.memory_space<vmem>>, vector<1x3x16xf32>
    %243 = vector.shape_cast %242 : vector<1x3x16xf32> to vector<3x16xf32>
    %244 = vector.shape_cast %241 : vector<3x16xf32> to vector<1x3x16xf32>
    tpu.vector_store %arg8[%c12_204, %c0_205, %c0_206], %244 {strides = array<i32>} : memref<16x3x16xf32, #tpu.memory_space<vmem>>, vector<1x3x16xf32>,
    %c0_207 = arith.constant 0 : index
    %c0_208 = arith.constant 0 : index
    %c13_209 = arith.constant 13 : index
    %c0_210 = arith.constant 0 : index
    %245 = vector.load %arg1[%c0_207, %c0_208, %c13_209, %c0_210] : memref<1x4x16x16xbf16, #tpu.memory_space<vmem>>, vector<1x4x1x16xbf16>
    %246 = vector.shape_cast %245 : vector<1x4x1x16xbf16> to vector<4x16xbf16>
    %cst_211 = arith.constant dense<0.000000e+00> : vector<3x16xf32>
    %247 = tpu.matmul %138, %246, %cst_211 {dimension_numbers = #tpu.dot_dimension_numbers<[1], [0], [0], [1], [0, 0, 1, 1], [], []>} : vector<3x4xbf16>, vector<4x16xbf16>, vector<3x16xf32> -> vector<3x16xf32>
    %248 = vector.broadcast %140 : vector<3x1xf32> to vector<3x16xf32>
    %249 = arith.addf %247, %248 : vector<3x16xf32>
    %c13_212 = arith.constant 13 : index
    %c0_213 = arith.constant 0 : index
    %c0_214 = arith.constant 0 : index
    %250 = vector.load %arg8[%c13_212, %c0_213, %c0_214] : memref<16x3x16xf32, #tpu.memory_space<vmem>>, vector<1x3x16xf32>
    %251 = vector.shape_cast %250 : vector<1x3x16xf32> to vector<3x16xf32>
    %252 = vector.shape_cast %249 : vector<3x16xf32> to vector<1x3x16xf32>
    tpu.vector_store %arg8[%c13_212, %c0_213, %c0_214], %252 {strides = array<i32>} : memref<16x3x16xf32, #tpu.memory_space<vmem>>, vector<1x3x16xf32>,
    %c0_215 = arith.constant 0 : index
    %c0_216 = arith.constant 0 : index
    %c14_217 = arith.constant 14 : index
    %c0_218 = arith.constant 0 : index
    %253 = vector.load %arg1[%c0_215, %c0_216, %c14_217, %c0_218] : memref<1x4x16x16xbf16, #tpu.memory_space<vmem>>, vector<1x4x1x16xbf16>
    %254 = vector.shape_cast %253 : vector<1x4x1x16xbf16> to vector<4x16xbf16>
    %cst_219 = arith.constant dense<0.000000e+00> : vector<3x16xf32>
    %255 = tpu.matmul %138, %254, %cst_219 {dimension_numbers = #tpu.dot_dimension_numbers<[1], [0], [0], [1], [0, 0, 1, 1], [], []>} : vector<3x4xbf16>, vector<4x16xbf16>, vector<3x16xf32> -> vector<3x16xf32>
    %256 = vector.broadcast %140 : vector<3x1xf32> to vector<3x16xf32>
    %257 = arith.addf %255, %256 : vector<3x16xf32>
    %c14_220 = arith.constant 14 : index
    %c0_221 = arith.constant 0 : index
    %c0_222 = arith.constant 0 : index
    %258 = vector.load %arg8[%c14_220, %c0_221, %c0_222] : memref<16x3x16xf32, #tpu.memory_space<vmem>>, vector<1x3x16xf32>
    %259 = vector.shape_cast %258 : vector<1x3x16xf32> to vector<3x16xf32>
    %260 = vector.shape_cast %257 : vector<3x16xf32> to vector<1x3x16xf32>
    tpu.vector_store %arg8[%c14_220, %c0_221, %c0_222], %260 {strides = array<i32>} : memref<16x3x16xf32, #tpu.memory_space<vmem>>, vector<1x3x16xf32>,
    %c0_223 = arith.constant 0 : index
    %c0_224 = arith.constant 0 : index
    %c15_225 = arith.constant 15 : index
    %c0_226 = arith.constant 0 : index
    %261 = vector.load %arg1[%c0_223, %c0_224, %c15_225, %c0_226] : memref<1x4x16x16xbf16, #tpu.memory_space<vmem>>, vector<1x4x1x16xbf16>
    %262 = vector.shape_cast %261 : vector<1x4x1x16xbf16> to vector<4x16xbf16>
    %cst_227 = arith.constant dense<0.000000e+00> : vector<3x16xf32>
    %263 = tpu.matmul %138, %262, %cst_227 {dimension_numbers = #tpu.dot_dimension_numbers<[1], [0], [0], [1], [0, 0, 1, 1], [], []>} : vector<3x4xbf16>, vector<4x16xbf16>, vector<3x16xf32> -> vector<3x16xf32>
    %264 = vector.broadcast %140 : vector<3x1xf32> to vector<3x16xf32>
    %265 = arith.addf %263, %264 : vector<3x16xf32>
    %c15_228 = arith.constant 15 : index
    %c0_229 = arith.constant 0 : index
    %c0_230 = arith.constant 0 : index
    %266 = vector.load %arg8[%c15_228, %c0_229, %c0_230] : memref<16x3x16xf32, #tpu.memory_space<vmem>>, vector<1x3x16xf32>
    %267 = vector.shape_cast %266 : vector<1x3x16xf32> to vector<3x16xf32>
    %268 = vector.shape_cast %265 : vector<3x16xf32> to vector<1x3x16xf32>
    tpu.vector_store %arg8[%c15_228, %c0_229, %c0_230], %268 {strides = array<i32>} : memref<16x3x16xf32, #tpu.memory_space<vmem>>, vector<1x3x16xf32>,
    %c0_231 = arith.constant 0 : index
    %c0_232 = arith.constant 0 : index
    %c0_233 = arith.constant 0 : index
    %269 = vector.load %arg8[%c0_231, %c0_232, %c0_233] : memref<16x3x16xf32, #tpu.memory_space<vmem>>, vector<16x1x16xf32>
    %270 = vector.shape_cast %269 : vector<16x1x16xf32> to vector<16x16xf32>
    %c0_234 = arith.constant 0 : index
    %c1_235 = arith.constant 1 : index
    %c0_236 = arith.constant 0 : index
    %271 = vector.load %arg8[%c0_234, %c1_235, %c0_236] : memref<16x3x16xf32, #tpu.memory_space<vmem>>, vector<16x1x16xf32>
    %272 = vector.shape_cast %271 : vector<16x1x16xf32> to vector<16x16xf32>
    %c0_237 = arith.constant 0 : index
    %c2_238 = arith.constant 2 : index
    %c0_239 = arith.constant 0 : index
    %273 = vector.load %arg8[%c0_237, %c2_238, %c0_239] : memref<16x3x16xf32, #tpu.memory_space<vmem>>, vector<16x1x16xf32>
    %274 = vector.shape_cast %273 : vector<16x1x16xf32> to vector<16x16xf32>
    %cst_240 = arith.constant dense<0.000000e+00> : vector<16x16xf32>
    %275 = tpu.matmul %270, %272, %cst_240 {dimension_numbers = #tpu.dot_dimension_numbers<[1], [1], [0], [0], [0, 0, 1, 0], [], []>} : vector<16x16xf32>, vector<16x16xf32>, vector<16x16xf32> -> vector<16x16xf32>
    %cst_241 = arith.constant dense<0xFF800000> : vector<16xf32>
    %276 = vector.multi_reduction <maximumf>, %275, %cst_241 [1] : vector<16x16xf32> to vector<16xf32>
    %277 = vector.shape_cast %276 : vector<16xf32> to vector<16x1xf32>
    %278 = vector.broadcast %277 : vector<16x1xf32> to vector<16x16xf32>
    %279 = arith.subf %275, %278 : vector<16x16xf32>
    %280 = math.exp %279 : vector<16x16xf32>
    %cst_242 = arith.constant dense<0.000000e+00> : vector<16xf32>
    %281 = vector.multi_reduction <add>, %280, %cst_242 [1] : vector<16x16xf32> to vector<16xf32>
    %282 = vector.shape_cast %281 : vector<16xf32> to vector<16x1xf32>
    %283 = tpu.reciprocal %282 {approx = true} : vector<16x1xf32> -> vector<16x1xf32>
    %284 = vector.broadcast %283 : vector<16x1xf32> to vector<16x16xf32>
    %285 = arith.mulf %280, %284 : vector<16x16xf32>
    %cst_243 = arith.constant dense<0.000000e+00> : vector<16x16xf32>
    %286 = tpu.matmul %285, %274, %cst_243 {dimension_numbers = #tpu.dot_dimension_numbers<[1], [0], [0], [1], [0, 0, 1, 1], [], []>} : vector<16x16xf32>, vector<16x16xf32>, vector<16x16xf32> -> vector<16x16xf32>
    %287 = arith.addf %286, %274 : vector<16x16xf32>
    %c0_244 = arith.constant 0 : index
    %c0_245 = arith.constant 0 : index
    %c0_246 = arith.constant 0 : index
    %c0_247 = arith.constant 0 : index
    %288 = vector.load %arg7[%c0_244, %c0_245, %c0_246, %c0_247] : memref<1x1x16x16xf32, #tpu.memory_space<vmem>>, vector<1x1x16x16xf32>
    %289 = vector.shape_cast %288 : vector<1x1x16x16xf32> to vector<16x16xf32>
    %290 = vector.shape_cast %287 : vector<16x16xf32> to vector<1x1x16x16xf32>
    tpu.vector_store %arg7[%c0_244, %c0_245, %c0_246, %c0_247], %290 {strides = array<i32>} : memref<1x1x16x16xf32, #tpu.memory_space<vmem>>, vector<1x1x16x16xf32>,
    return
  }
  func.func @transform_0(%arg0: i32) -> (i32, i32, i32, i32) {
    %c0_i32 = arith.constant 0 : i32
    %c0_i32_0 = arith.constant 0 : i32
    %c0_i32_1 = arith.constant 0 : i32
    %c0_i32_2 = arith.constant 0 : i32
    return %arg0, %c0_i32, %c0_i32_0, %c0_i32_1 : i32, i32, i32, i32
  }
  func.func @transform_1(%arg0: i32) -> (i32, i32) {
    %c0_i32 = arith.constant 0 : i32
    %c0_i32_0 = arith.constant 0 : i32
    %c0_i32_1 = arith.constant 0 : i32
    return %c0_i32, %c0_i32_0 : i32, i32
  }
  func.func @transform_2(%arg0: i32) -> (i32, i32) {
    %c0_i32 = arith.constant 0 : i32
    %c0_i32_0 = arith.constant 0 : i32
    %c0_i32_1 = arith.constant 0 : i32
    return %c0_i32, %c0_i32_0 : i32, i32
  }
  func.func @transform_3(%arg0: i32) -> (i32, i32) {
    %c0_i32 = arith.constant 0 : i32
    %c0_i32_0 = arith.constant 0 : i32
    %c0_i32_1 = arith.constant 0 : i32
    return %c0_i32, %c0_i32_0 : i32, i32
  }
  func.func @transform_4(%arg0: i32) -> (i32, i32) {
    %c0_i32 = arith.constant 0 : i32
    %c0_i32_0 = arith.constant 0 : i32
    %c0_i32_1 = arith.constant 0 : i32
    return %c0_i32, %c0_i32_0 : i32, i32
  }
  func.func @transform_5(%arg0: i32) -> (i32, i32) {
    %c0_i32 = arith.constant 0 : i32
    %c0_i32_0 = arith.constant 0 : i32
    %c0_i32_1 = arith.constant 0 : i32
    return %c0_i32, %c0_i32_0 : i32, i32
  }
  func.func @transform_6(%arg0: i32) -> (i32, i32, i32, i32) {
    %c0_i32 = arith.constant 0 : i32
    %c0_i32_0 = arith.constant 0 : i32
    %c0_i32_1 = arith.constant 0 : i32
    %c0_i32_2 = arith.constant 0 : i32
    return %arg0, %c0_i32, %c0_i32_0, %c0_i32_1 : i32, i32, i32, i32
  }
}

</mosaic_0001>

<bundles_post_ra>
// kernel: tpu_custom_call.1
= control target key start
LH: loop header
LB: loop body
LE: loop exit
PB: predicated region body
PF: predicated region fallthrough
CT: control target
= control target key end

     0   :  { %11 = vsyncpa [#allocation4], 0  ;;  %s3115_s0 = inlined_call_operand.hbm [shape: bf16[2,4,16,16], index: 0, kind: input, shape index: {}]   ;;  %s3116_s1 = inlined_call_operand.vmem [shape: f32[4,2], index: 1, kind: input, shape index: {}]   ;;  %s3117_s2 = inlined_call_operand.vmem [shape: f32[12,4], index: 2, kind: input, shape index: {}]   ;;  %s3118_s3 = inlined_call_operand.vmem [shape: f32[4,4], index: 3, kind: input, shape index: {}]   ;;  %s3119_s4 = inlined_call_operand.vmem [shape: f32[3,4], index: 4, kind: input, shape index: {}]   ;;  %s3120_s5 = inlined_call_operand.vmem [shape: f32[3,4], index: 5, kind: input, shape index: {}]   ;;  %s3121_s6 = inlined_call_operand.hbm [shape: f32[2,1,16,16], index: 6, kind: output, shape index: {}]  }
   0x1   :  { %13 = vsyncpa [#allocation4 + $0x1], 0 }
   0x2   :  { %14 = vsyncpa [#allocation5], 0 }
   0x3   :  { %16 = vsyncpa [#allocation5 + $0x1], 0  ;;  %s2564_s21 = smov 0   ;;  %s2566_s22 = smov 0  }
   0x4   :  { %s2568_s23 = smov 0   ;;  %s2570_s24 = smov 0  }
   0x5 LB: > { %s2585_s25 = sadd.s32 4294967295, %s2518_s24   ;;  %s2186_s26 = sadd.s32 4294967294, %s2518_s24   ;;  %s2518_s24 = sphi %s2570_s24, %s3131_s24   ;;  %s2514_s23 = sphi %s2568_s23, %s3130_s23   ;;  %s2510_s22 = sphi %s2566_s22, %s3129_s22   ;;  %s2506_s21 = sphi %s2564_s21, %s3128_s21  }
   0x6   : > { %s2589_s27 = sadd.s32 1, %s2518_s24   ;;  %s29_s28 = sadd.s32 1, %s2514_s23 }
   0x7   : > { %s26_s29 = ssub.s32 %s2518_s24, %s2589_s27  ;;  %p36_p0 = scmp.ne.s32.totalorder %s2514_s23, %s2510_s22 }
   0x8   : > { %p27_p1 = scmp.eq.s32.totalorder %s26_s29, 0  ;;  %p37_p2 = scmp.eq.s32.totalorder %s2518_s24, 0 }
   0x9   : > { %p42_p3 = scmp.ne.s32.totalorder %s2510_s22, %s2506_s21  ;;  %p43_p4 = scmp.eq.s32.totalorder %s2585_s25, 0 }
   0xa   : > { %s2601_s30 = scalar_select %p27_p1, %s2514_s23, %s29_s28  }
   0xb   : > { %p2603_p5 = por %p37_p2, %p36_p0  ;;  %p2607_p6 = por %p43_p4, %p42_p3 }
   0xc   : > { %p171_p7 = scmp.eq.s32.totalorder %s2585_s25, 1  ;;  %p177_p8 = scmp.eq.s32.totalorder %s2186_s26, 1 }
   0xd   : > { %p2360_p10 = scmp.lt.s32.totalorder %s2518_s24, 2  ;;  %s212_s11 = sand.u32 1, %s2514_s23  }
   0xe   : > { %p2614_p11 = por %p171_p7, %p36_p0  ;;  %p2618_p12 = por %p177_p8, %p42_p3 }
   0xf   : > { %s2345_s12 = sshll.u32 %s2518_s24, 5  ;;  %s2189_s13 = sshll.u32 %s212_s11, 5 }
  0x10   : > { %s221_s16 = scalar_lea.hbm %s3115_s0, %s2345_s12  ;;  %s216_s18 = scalar_lea.vmem [#allocation3], %s2189_s13 }
  0x11   : > { %s222_s17 = sshll.u32 %s221_s16, 4  ;;  %s224_s19 = sshll.u32 %s216_s18, 4  ;;  %s223_s17 = int_to_ptr.hbm [resolvable:$true] %s222_s17  ;;  %s225_s19 = int_to_ptr.vmem [resolvable:$true] %s224_s19 }
  0x12   : > { %p2629_p13 = pnand %p2360_p10, %p2603_p5  ;;  %p2192_p0 = scmp.ge.s32.totalorder %s2518_s24, 1 }
  0x13   : > { %p232_p1 = scmp.lt.s32.totalorder %s2518_s24, 3  ;;  %s213_s26 = scalar_lea.sflag [#allocation4], %s212_s11 }
  0x14   : > { %s2422_s28 = sshra.s32 %s223_s17, 4  ;;  %p2426_p3 = pneg %p2629_p13  ;;  %s2423_s28 = int_to_ptr.hbm [resolvable:$true] %s2422_s28 }
  0x15   : > { %s2424_s29 = scalar_lea.hbm %s2423_s28, 32  ;;  %s2429_s7 = scalar_lea.hbm %s3115_s0, 64 }
  0x16   : > { %p2425_p2 = scmp.ne.s32.totalorder %s2423_s28, %s2424_s29  ;;  %p2430_p5 = scmp.lt.s32.totalorder %s2423_s28, %s3115_s0 }
  0x17   : > { %p2431_p8 = scmp.lt.s32.totalorder %s2429_s7, %s2424_s29 }
  0x18   : > { %p2427_p4 = pnand %p2426_p3, %p2425_p2 }
  0x19   : > { %p2432_p10 = por %p2431_p8, %p2430_p5 }
  0x1a   : > { %p2428_p7 = pneg %p2427_p4 }
  0x1c   : > { %p2433_p9 = pnand %p2432_p10, %p2428_p7 }
  0x1e   : > { %2436 = shalt.err (!%p2433_p9)
}
  0x1f   : > { %s2520_s11 = smov 64   ;;  %s2521_s16 = smov 4  }
  0x20   : > { %2355 = dma.hbm_to_vmem [thread:$0]  (!%p2629_p13), %s223_s17, 512, %s225_s19, %s213_s26, %s2520_s11, %s2520_s11, %s2521_s16  }
  0x21   : > { %p233_p2 = pnand %p2192_p0, %p232_p1 }
  0x22   : > { %s2650_s18 = sand.u32 (!%p233_p2), 1, %s2510_s22  }
  0x23   : > { %236 = sbr.rel (%p233_p2) target bundleno = 2208 (0x8a0), region = 44  ;;  %s2193_s28 = sshll.u32 (!%p233_p2), %s2650_s18, 5 }
  0x24   : > { %s239_s29 = scalar_lea.sflag (!%p233_p2), [#allocation4], %s2650_s18  ;;  %s2654_s12 = scalar_lea.vmem (!%p233_p2), [#allocation3], %s2193_s28 }
  0x28   : > { %2497 = dma.done.wait (%p2607_p6), %s239_s29, 512  }
  0x29   : > { %2499 = vsyncadd (%p2607_p6), %s239_s29, 4294966784  ;;  %v2522_v0 = vmov 1065369472   ;;  %vm295_vm0 = vcmask 1041409   ;;  %vm298_vm1 = vcmask 1042434   ;;  %vm301_vm2 = vcmask 1043459  }
  0x2a   : > { %315 = vmatpush.bf16.msra.mxu0 %v2522_v0  ;;  %338 = vmatpush.bf16.msra.mxu1 %v2522_v0  ;;  %v274_v1 = vld [vmem:[%s2654_s12] sm:$0x1]  ;;  %v275_v2 = vld [vmem:[%s2654_s12 + $0x8] sm:$0x1]  ;;  %v276_v3 = vld [vmem:[%s2654_s12 + $0x10] sm:$0x1] }
  0x2b   : > { %381 = vmatpush.bf16.msra.mxu2 %v2522_v0  ;;  %405 = vmatpush.bf16.msra.mxu3 %v2522_v0  ;;  %v277_v4 = vld [vmem:[%s2654_s12 + $0x18] sm:$0x1]  ;;  %v282_v5 = vunpack.c.l.b16 %v274_v1  ;;  %v283_v6 = vunpack.c.l.b16 %v275_v2  ;;  %v284_v7 = vunpack.c.l.b16 %v276_v3  ;;  %v344_v8 = vld [vmem:[%s2654_s12] sm:$0x2]  ;;  %v345_v9 = vld [vmem:[%s2654_s12 + $0x8] sm:$0x2] }
  0x2c   : > { %v285_v10 = vunpack.c.l.b16 %v277_v4  ;;  %vm304_vm3 = vcmask 130048   ;;  %v346_v11 = vld [vmem:[%s2654_s12 + $0x10] sm:$0x2]  ;;  %v347_v12 = vld [vmem:[%s2654_s12 + $0x18] sm:$0x2]  ;;  %v352_v13 = vunpack.c.l.b16 %v344_v8  ;;  %v353_v14 = vunpack.c.l.b16 %v345_v9  ;;  %s2523_s19 = smov 127  }
  0x2d   : > { %v2195_v15 = vunpack.i.l.s16 %v282_v5  ;;  %v2196_v16 = vunpack.i.l.s16 %v283_v6  ;;  %v2197_v17 = vunpack.i.l.s16 %v284_v7  ;;  %v354_v18 = vunpack.c.l.b16 %v346_v11  ;;  %v412_v39 = vld [vmem:[%s2654_s12] sm:$0x4]  ;;  %v413_v40 = vld [vmem:[%s2654_s12 + $0x8] sm:$0x4]  ;;  %v414_v45 = vld [vmem:[%s2654_s12 + $0x10] sm:$0x4] }
  0x2e   : > { %450 = vmatpush.bf16.msrb.mxu0 %v2522_v0  ;;  %475 = vmatpush.bf16.msrb.mxu1 %v2522_v0  ;;  %v2198_v19 = vunpack.i.l.s16 %v285_v10  ;;  %v355_v20 = vunpack.c.l.b16 %v347_v12  ;;  %v2201_v21 = vunpack.i.l.s16 %v352_v13  ;;  %v2202_v22 = vunpack.i.l.s16 %v353_v14  ;;  %v415_v46 = vld [vmem:[%s2654_s12 + $0x18] sm:$0x4]  ;;  %v482_v51 = vld [vmem:[%s2654_s12] sm:$0x8]  ;;  %v483_v56 = vld [vmem:[%s2654_s12 + $0x8] sm:$0x8] }
  0x2f   : > { %520 = vmatpush.bf16.msrb.mxu2 %v2522_v0  ;;  %545 = vmatpush.bf16.msrb.mxu3 %v2522_v0  ;;  %v294_v23 = vrot.slane %v2195_v15, 1  ;;  %v297_v24 = vrot.slane %v2197_v17, 7  ;;  %v321_v25 = vrot.slane %v2196_v16, 7  ;;  %v323_v26 = vrot.slane %v2197_v17, 6  ;;  %v484_v5 = vld [vmem:[%s2654_s12 + $0x10] sm:$0x8] }
  0x30   : > { %v300_v27 = vrot.slane %v2198_v19, 6  ;;  %v325_v28 = vrot.slane %v2198_v19, 5  ;;  %v2203_v29 = vunpack.i.l.s16 %v354_v18  ;;  %v2204_v30 = vunpack.i.l.s16 %v355_v20  ;;  %v485_v6 = vld [vmem:[%s2654_s12 + $0x18] sm:$0x8]  ;;  %s2346_s8 = sshll.u32 %s2585_s25, 4  ;;  %s2098_s14 = scalar_lea.sflag [#allocation5], %s2650_s18 }
  0x31   : > { %v296_v31 = vsel %vm295_vm0, %v2196_v16, %v294_v23  ;;  %v322_v32 = vsel %vm295_vm0, %v321_v25, %v2195_v15  ;;  %v364_v33 = vrot.slane %v2201_v21, 2  ;;  %v365_v34 = vrot.slane %v2202_v22, 1  ;;  %s2109_s26 = scalar_lea.hbm %s3121_s6, %s2346_s8  ;;  %s2472_s28 = scalar_lea.hbm %s3121_s6, 32 }
  0x32   : > { %v299_v35 = vsel %vm298_vm1, %v297_v24, %v296_v31  ;;  %v324_v36 = vsel %vm298_vm1, %v323_v26, %v322_v32  ;;  %v368_v37 = vrot.slane %v2204_v30, 7  ;;  %v388_v38 = vrot.slane %v2201_v21, 3  ;;  %s2112_s7 = sshll.u32 %s2109_s26, 4  ;;  %s2113_s7 = int_to_ptr.hbm [resolvable:$true] %s2112_s7 }
  0x33   : > { %v302_v41 = vsel %vm301_vm2, %v300_v27, %v299_v35  ;;  %v326_v42 = vsel %vm301_vm2, %v325_v28, %v324_v36  ;;  %v366_v43 = vsel %vm295_vm0, %v365_v34, %v364_v33  ;;  %v389_v44 = vrot.slane %v2202_v22, 2  ;;  %v552_v28 = vld [vmem:[%s2654_s12 + $0x4] sm:$0x1]  ;;  %v553_v33 = vld [vmem:[%s2654_s12 + $0xc] sm:$0x1]  ;;  %s2466_s25 = sshra.s32 %s2113_s7, 4  ;;  %s2467_s25 = int_to_ptr.hbm [resolvable:$true] %s2466_s25 }
  0x34   : > { %v303_v47 = vpack.c.b16 %v302_v41, %v302_v41  ;;  %v2687_v48 = vpack.c.b16 %v326_v42, %v326_v42  ;;  %v367_v49 = vsel %vm298_vm1, %v2203_v29, %v366_v43  ;;  %v391_v50 = vrot.slane %v2203_v29, 1  ;;  %v554_v34 = vld [vmem:[%s2654_s12 + $0x14] sm:$0x1]  ;;  %s2468_s15 = scalar_lea.hbm %s2467_s25, 16  ;;  %p2473_p0 = scmp.lt.s32.totalorder %s2467_s25, %s3121_s6 }
  0x35   : > { %v369_v52 = vsel %vm301_vm2, %v368_v37, %v367_v49  ;;  %v390_v53 = vsel %vm295_vm0, %v389_v44, %v388_v38  ;;  %v420_v54 = vunpack.c.l.b16 %v412_v39  ;;  %v421_v55 = vunpack.c.l.b16 %v413_v40  ;;  %v555_v39 = vld [vmem:[%s2654_s12 + $0x1c] sm:$0x1]  ;;  %v620_v49 = vld [vmem:[%s2654_s12 + $0x4] sm:$0x2]  ;;  %p2469_p6 = scmp.ne.s32.totalorder %s2467_s25, %s2468_s15  ;;  %p2474_p1 = scmp.lt.s32.totalorder %s2472_s28, %s2468_s15 }
  0x36   : > { %2199 = vmatmul.msk.bf16.vlgmr.msra.gmra.mxu0 %vm304_vm3, %v303_v47  ;;  %2200 = vmatmul.msk.bf16.vlgmr.msra.gmra.mxu1 %vm304_vm3, %v2687_v48  ;;  %v370_v57 = vpack.c.b16 %v369_v52, %v369_v52  ;;  %v392_v58 = vsel %vm298_vm1, %v391_v50, %v390_v53  ;;  %v422_v59 = vunpack.c.l.b16 %v414_v45  ;;  %v423_v60 = vunpack.c.l.b16 %v415_v46 }
  0x37   : > { %v393_v61 = vsel %vm301_vm2, %v2204_v30, %v392_v58  ;;  %v2207_v62 = vunpack.i.l.s16 %v420_v54  ;;  %v2208_v63 = vunpack.i.l.s16 %v421_v55  ;;  %v490_v1 = vunpack.c.l.b16 %v482_v51  ;;  %589 = vmatpush.bf16.msra.mxu0 %v2522_v0  ;;  %613 = vmatpush.bf16.msra.mxu1 %v2522_v0  ;;  %v621_v54 = vld [vmem:[%s2654_s12 + $0xc] sm:$0x2]  ;;  %v622_v58 = vld [vmem:[%s2654_s12 + $0x14] sm:$0x2]  ;;  %p2470_p9 = pnand %p2469_p6, %p2614_p11  ;;  %p2475_p3 = por %p2474_p1, %p2473_p0 }
  0x38   : > { %2205 = vmatmul.msk.bf16.vlgmr.msra.gmra.mxu2 %vm304_vm3, %v370_v57  ;;  %v394_v2 = vpack.c.b16 %v393_v61, %v393_v61  ;;  %v2209_v3 = vunpack.i.l.s16 %v422_v59  ;;  %v2210_v4 = vunpack.i.l.s16 %v423_v60  ;;  %v491_v7 = vunpack.c.l.b16 %v483_v56  ;;  %v623_v61 = vld [vmem:[%s2654_s12 + $0x1c] sm:$0x2] }
  0x39   : > { %v432_v8 = vrot.slane %v2207_v62, 4  ;;  %v433_v9 = vrot.slane %v2208_v63, 3  ;;  %v457_v10 = vrot.slane %v2207_v62, 5  ;;  %v458_v11 = vrot.slane %v2208_v63, 4  ;;  %657 = vmatpush.bf16.msra.mxu2 %v2522_v0  ;;  %p2471_p13 = pneg %p2470_p9 }
  0x3a   : > { %2206 = vmatmul.msk.bf16.vlgmr.msra.gmra.mxu3 %vm304_vm3, %v394_v2  ;;  %v435_v12 = vrot.slane %v2209_v3, 2  ;;  %v437_v13 = vrot.slane %v2210_v4, 1  ;;  %v460_v14 = vrot.slane %v2209_v3, 3  ;;  %v462_v15 = vrot.slane %v2210_v4, 2 }
  0x3b   : > { %v434_v16 = vsel %vm295_vm0, %v433_v9, %v432_v8  ;;  %v459_v17 = vsel %vm295_vm0, %v458_v11, %v457_v10  ;;  %v492_v18 = vunpack.c.l.b16 %v484_v5  ;;  %v493_v19 = vunpack.c.l.b16 %v485_v6  ;;  %681 = vmatpush.bf16.msra.mxu3 %v2522_v0  ;;  %p2476_p4 = pnand %p2475_p3, %p2471_p13 }
  0x3c   : > { %v436_v20 = vsel %vm298_vm1, %v435_v12, %v434_v16  ;;  %v461_v21 = vsel %vm298_vm1, %v460_v14, %v459_v17  ;;  %v2213_v22 = vunpack.i.l.s16 %v490_v1  ;;  %v2214_v23 = vunpack.i.l.s16 %v491_v7  ;;  %v689_v16 = vld [vmem:[%s2654_s12 + $0xc] sm:$0x4] }
  0x3d   : > { %v438_v24 = vsel %vm301_vm2, %v437_v13, %v436_v20  ;;  %v463_v25 = vsel %vm301_vm2, %v462_v15, %v461_v21  ;;  %v2215_v26 = vunpack.i.l.s16 %v492_v18  ;;  %v2216_v27 = vunpack.i.l.s16 %v493_v19  ;;  %v688_v15 = vld [vmem:[%s2654_s12 + $0x4] sm:$0x4]  ;;  %v2741_v20 = vld [vmem:[%s3116_s1] sm:$0xf] }
  0x3e   : > { %v439_v29 = vpack.c.b16 %v438_v24, %v438_v24  ;;  %v464_v30 = vpack.c.b16 %v463_v25, %v463_v25  ;;  %v502_v31 = vrot.slane %v2213_v22, 6  ;;  %v503_v32 = vrot.slane %v2214_v23, 5  ;;  %832 = vrot.lane.b32.xlu0 %v2741_v20, %s2523_s19 }
  0x3f   : > { %v505_v35 = vrot.slane %v2215_v26, 4  ;;  %v507_v36 = vrot.slane %v2216_v27, 3  ;;  %v527_v37 = vrot.slane %v2213_v22, 7  ;;  %v528_v38 = vrot.slane %v2214_v23, 6 }
  0x40   : > { %v504_v40 = vsel %vm295_vm0, %v503_v32, %v502_v31  ;;  %v530_v41 = vrot.slane %v2215_v26, 5  ;;  %v532_v42 = vrot.slane %v2216_v27, 4  ;;  %v560_v43 = vunpack.c.l.b16 %v552_v28  ;;  %v690_v27 = vld [vmem:[%s2654_s12 + $0x14] sm:$0x4] }
  0x41   : > { %v506_v44 = vsel %vm298_vm1, %v505_v35, %v504_v40  ;;  %v529_v45 = vsel %vm295_vm0, %v528_v38, %v527_v37  ;;  %v561_v46 = vunpack.c.l.b16 %v553_v33  ;;  %v562_v47 = vunpack.c.l.b16 %v554_v34  ;;  %v758_v33 = vld [vmem:[%s2654_s12 + $0x4] sm:$0x8]  ;;  %v760_v37 = vld [vmem:[%s2654_s12 + $0x14] sm:$0x8] }
  0x42   : > { %v508_v50 = vsel %vm301_vm2, %v507_v36, %v506_v44  ;;  %v531_v51 = vsel %vm298_vm1, %v530_v41, %v529_v45  ;;  %v563_v52 = vunpack.c.l.b16 %v555_v39  ;;  %v2219_v53 = vunpack.i.l.s16 %v560_v43  ;;  %v759_v36 = vld [vmem:[%s2654_s12 + $0xc] sm:$0x8]  ;;  %v691_v39 = vld [vmem:[%s2654_s12 + $0x1c] sm:$0x4] }
  0x43   : > { %v533_v55 = vsel %vm301_vm2, %v532_v42, %v531_v51  ;;  %v2220_v56 = vunpack.i.l.s16 %v561_v46  ;;  %v2221_v57 = vunpack.i.l.s16 %v562_v47  ;;  %v509_v59 = vpack.c.b16 %v508_v50, %v508_v50  ;;  %v761_v46 = vld [vmem:[%s2654_s12 + $0x1c] sm:$0x8] }
  0x44   : > { %v596_v60 = vrot.slane %v2219_v53, 1  ;;  %v628_v62 = vunpack.c.l.b16 %v620_v49  ;;  %v629_v1 = vunpack.c.l.b16 %v621_v54  ;;  %v534_v2 = vpack.c.b16 %v533_v55, %v533_v55 }
  0x45   : > { %v572_v63 = vrot.slane %v2220_v56, 7  ;;  %v2222_v3 = vunpack.i.l.s16 %v563_v52  ;;  %v630_v4 = vunpack.c.l.b16 %v622_v58  ;;  %v574_v5 = vrot.slane %v2221_v57, 6 }
  0x46   : > { %2211 = vmatmul.msk.bf16.vlgmr.msrb.gmra.mxu0 %vm304_vm3, %v439_v29  ;;  %2212 = vmatmul.msk.bf16.vlgmr.msrb.gmra.mxu1 %vm304_vm3, %v464_v30  ;;  %v598_v6 = vrot.slane %v2221_v57, 7  ;;  %v631_v7 = vunpack.c.l.b16 %v623_v61  ;;  %v2225_v8 = vunpack.i.l.s16 %v628_v62  ;;  %v597_v10 = vsel %vm295_vm0, %v2220_v56, %v596_v60 }
  0x47   : > { %726 = vmatpush.bf16.msrb.mxu0 %v2522_v0  ;;  %751 = vmatpush.bf16.msrb.mxu1 %v2522_v0  ;;  %v573_v9 = vsel %vm295_vm0, %v572_v63, %v2219_v53  ;;  %v2226_v11 = vunpack.i.l.s16 %v629_v1  ;;  %v2227_v12 = vunpack.i.l.s16 %v630_v4  ;;  %v576_v22 = vrot.slane %v2222_v3, 5 }
  0x48   : > { %2217 = vmatmul.msk.bf16.vlgmr.msrb.gmra.mxu2 %vm304_vm3, %v509_v59  ;;  %v2228_v13 = vunpack.i.l.s16 %v631_v7  ;;  %v640_v14 = vrot.slane %v2225_v8, 2  ;;  %v664_v18 = vrot.slane %v2225_v8, 3  ;;  %v575_v21 = vsel %vm298_vm1, %v574_v5, %v573_v9 }
  0x49   : > { %796 = vmatpush.bf16.msrb.mxu2 %v2522_v0  ;;  %v641_v17 = vrot.slane %v2226_v11, 1  ;;  %v665_v19 = vrot.slane %v2226_v11, 2  ;;  %v599_v23 = vsel %vm298_vm1, %v598_v6, %v597_v10  ;;  %v600_v24 = vrot.slane %v2222_v3, 6 }
  0x4a   : > { %2218 = vmatmul.msk.bf16.vlgmr.msrb.gmra.mxu3 %vm304_vm3, %v534_v2  ;;  %v667_v26 = vrot.slane %v2227_v12, 1  ;;  %v696_v28 = vunpack.c.l.b16 %v688_v15  ;;  %v697_v29 = vunpack.c.l.b16 %v689_v16  ;;  %v644_v30 = vrot.slane %v2228_v13, 7 }
  0x4b   : > { %821 = vmatpush.bf16.msrb.mxu3 %v2522_v0  ;;  %v642_v25 = vsel %vm295_vm0, %v641_v17, %v640_v14  ;;  %v666_v31 = vsel %vm295_vm0, %v665_v19, %v664_v18  ;;  %v577_v0 = vsel %vm301_vm2, %v576_v22, %v575_v21  ;;  %v601_v34 = vsel %vm301_vm2, %v600_v24, %v599_v23 }
  0x4c   : > { %v643_v32 = vsel %vm298_vm1, %v2227_v12, %v642_v25  ;;  %v698_v35 = vunpack.c.l.b16 %v690_v27  ;;  %v668_v38 = vsel %vm298_vm1, %v667_v26, %v666_v31  ;;  %v2231_v40 = vunpack.i.l.s16 %v696_v28 }
  0x4d   : > { %v2232_v41 = vunpack.i.l.s16 %v697_v29  ;;  %v645_v42 = vsel %vm301_vm2, %v644_v30, %v643_v32  ;;  %v766_v43 = vunpack.c.l.b16 %v758_v33  ;;  %v578_v44 = vpack.c.b16 %v577_v0, %v577_v0 }
  0x4e   : > { %v602_v45 = vpack.c.b16 %v601_v34, %v601_v34  ;;  %v767_v47 = vunpack.c.l.b16 %v759_v36  ;;  %v768_v49 = vunpack.c.l.b16 %v760_v37  ;;  %v669_v50 = vsel %vm301_vm2, %v2228_v13, %v668_v38 }
  0x4f   : > { %v699_v51 = vunpack.c.l.b16 %v691_v39  ;;  %v2233_v52 = vunpack.i.l.s16 %v698_v35  ;;  %v2237_v53 = vunpack.i.l.s16 %v766_v43  ;;  %v646_v54 = vpack.c.b16 %v645_v42, %v645_v42 }
  0x50   : > { %v708_v55 = vrot.slane %v2231_v40, 4  ;;  %v709_v56 = vrot.slane %v2232_v41, 3  ;;  %v2238_v57 = vunpack.i.l.s16 %v767_v47  ;;  %v733_v58 = vrot.slane %v2231_v40, 5 }
  0x51   : > { %v734_v59 = vrot.slane %v2232_v41, 4  ;;  %v769_v60 = vunpack.c.l.b16 %v761_v46  ;;  %v670_v61 = vpack.c.b16 %v669_v50, %v669_v50  ;;  %v2239_v62 = vunpack.i.l.s16 %v768_v49 }
  0x52   : > { %v2234_v63 = vunpack.i.l.s16 %v699_v51  ;;  %v778_v1 = vrot.slane %v2237_v53, 6  ;;  %v779_v2 = vrot.slane %v2238_v57, 5  ;;  %v710_v3 = vsel %vm295_vm0, %v709_v56, %v708_v55 }
  0x53   : > { %v711_v4 = vrot.slane %v2233_v52, 2  ;;  %v736_v5 = vrot.slane %v2233_v52, 3  ;;  %v735_v6 = vsel %vm295_vm0, %v734_v59, %v733_v58  ;;  %v2240_v7 = vunpack.i.l.s16 %v769_v60 }
  0x54   : > { %v803_v8 = vrot.slane %v2237_v53, 7  ;;  %v804_v9 = vrot.slane %v2238_v57, 6  ;;  %v781_v10 = vrot.slane %v2239_v62, 4  ;;  %v713_v11 = vrot.slane %v2234_v63, 1 }
  0x55   : > { %v738_v12 = vrot.slane %v2234_v63, 2  ;;  %v780_v13 = vsel %vm295_vm0, %v779_v2, %v778_v1  ;;  %v712_v14 = vsel %vm298_vm1, %v711_v4, %v710_v3  ;;  %v737_v15 = vsel %vm298_vm1, %v736_v5, %v735_v6 }
  0x56   : > { %2223 = vmatmul.msk.bf16.vlgmr.msra.gmra.mxu0 %vm304_vm3, %v578_v44  ;;  %2224 = vmatmul.msk.bf16.vlgmr.msra.gmra.mxu1 %vm304_vm3, %v602_v45  ;;  %v806_v16 = vrot.slane %v2239_v62, 5  ;;  %v783_v17 = vrot.slane %v2240_v7, 3  ;;  %v805_v18 = vsel %vm295_vm0, %v804_v9, %v803_v8  ;;  %v782_v19 = vsel %vm298_vm1, %v781_v10, %v780_v13 }
  0x57   : > { %v714_v21 = vsel %vm301_vm2, %v713_v11, %v712_v14  ;;  %v739_v22 = vsel %vm301_vm2, %v738_v12, %v737_v15  ;;  %v808_v23 = vrot.slane %v2240_v7, 4  ;;  %vm845_vm4 = vcmask 1043456  }
  0x58   : > { %2229 = vmatmul.msk.bf16.vlgmr.msra.gmra.mxu2 %vm304_vm3, %v646_v54  ;;  %v807_v24 = vsel %vm298_vm1, %v806_v16, %v805_v18  ;;  %v784_v25 = vsel %vm301_vm2, %v783_v17, %v782_v19  ;;  %v715_v26 = vpack.c.b16 %v714_v21, %v714_v21  ;;  %v740_v27 = vpack.c.b16 %v739_v22, %v739_v22  ;;  %v836_v18 = vld [vmem:[%s3117_s2] sm:$0xff] }
  0x59   : > { %v809_v28 = vsel %vm301_vm2, %v808_v23, %v807_v24  ;;  %v785_v29 = vpack.c.b16 %v784_v25, %v784_v25  ;;  %vm838_vm5 = vcmask 31744   ;;  %vm874_vm6 = vcmask 7168   ;;  %v837_v24 = vld [vmem:[%s3117_s2 + $0x8] sm:$0xf] }
  0x5a   : > { %2230 = vmatmul.msk.bf16.vlgmr.msra.gmra.mxu3 %vm304_vm3, %v670_v61  ;;  %v810_v30 = vpack.c.b16 %v809_v28, %v809_v28  ;;  %vm899_vm7 = vcmask 27648  }
  0x66   : > { %2235 = vmatmul.msk.bf16.vlgmr.msrb.gmra.mxu0 %vm304_vm3, %v715_v26  ;;  %2236 = vmatmul.msk.bf16.vlgmr.msrb.gmra.mxu1 %vm304_vm3, %v740_v27 }
  0x68   : > { %2241 = vmatmul.msk.bf16.vlgmr.msrb.gmra.mxu2 %vm304_vm3, %v785_v29 }
  0x6a   : > { %2242 = vmatmul.msk.bf16.vlgmr.msrb.gmra.mxu3 %vm304_vm3, %v810_v30 }
  0xb0   : > { %v833_v14 = vpop.permute.xlu0 %832 }
  0xb3   : > { %v317_v31 = vpop.f32.mrf.mxu0  ;;  %v340_v32 = vpop.f32.mrf.mxu1 }
  0xb4   : > { %v341_v40 = vadd.f32 %v340_v32, %v317_v31 }
  0xbb   : > { %v383_v33 = vpop.f32.mrf.mxu2  ;;  %v319_v0 = vpop.f32.mrf.mxu0 }
  0xbc   : > { %v342_v34 = vpop.f32.mrf.mxu1  ;;  %v387_v41 = vadd.f32 %v383_v33, %v341_v40 }
  0xbd   : > { %v407_v35 = vpop.f32.mrf.mxu3 }
  0xbe   : > { %v411_v44 = vadd.f32 %v407_v35, %v387_v41 }
  0xc3   : > { %v385_v36 = vpop.f32.mrf.mxu2  ;;  %v452_v37 = vpop.f32.mrf.mxu0 }
  0xc4   : > { %v477_v38 = vpop.f32.mrf.mxu1  ;;  %v456_v47 = vadd.f32 %v452_v37, %v411_v44  ;;  %v2524_v44 = vmov 0  }
  0xc5   : > { %v409_v39 = vpop.f32.mrf.mxu3  ;;  %2403 = vset.pattern.permute.xlu1 %v2524_v44  ;;  %2404 = vset.pattern.permute.xlu2 %v2524_v44 }
  0xc6   : > { %v481_v49 = vadd.f32 %v477_v38, %v456_v47  ;;  %2405 = vset.pattern.permute.xlu0 %v2524_v44 }
  0xcb   : > { %v522_v42 = vpop.f32.mrf.mxu2  ;;  %v454_v43 = vpop.f32.mrf.mxu0 }
  0xcc   : > { %v479_v45 = vpop.f32.mrf.mxu1  ;;  %v526_v52 = vadd.f32 %v522_v42, %v481_v49  ;;  %v950_v42 = vld [vmem:[%s3118_s3] sm:$0xf] }
  0xcd   : > { %v547_v46 = vpop.f32.mrf.mxu3 }
  0xce   : > { %v551_v55 = vadd.f32 %v547_v46, %v526_v52 }
  0xd3   : > { %v524_v50 = vpop.f32.mrf.mxu2  ;;  %v591_v51 = vpop.f32.mrf.mxu0 }
  0xd4   : > { %v615_v53 = vpop.f32.mrf.mxu1  ;;  %v595_v56 = vadd.f32 %v591_v51, %v551_v55 }
  0xd5   : > { %v549_v54 = vpop.f32.mrf.mxu3 }
  0xd6   : > { %v619_v61 = vadd.f32 %v615_v53, %v595_v56 }
  0xdb   : > { %v659_v57 = vpop.f32.mrf.mxu2  ;;  %v593_v58 = vpop.f32.mrf.mxu0 }
  0xdc   : > { %v617_v59 = vpop.f32.mrf.mxu1  ;;  %v663_v62 = vadd.f32 %v659_v57, %v619_v61  ;;  %v2525_v61 = vmov 1.0  }
  0xdd   : > { %v683_v60 = vpop.f32.mrf.mxu3 }
  0xde   : > { %v687_v2 = vadd.f32 %v683_v60, %v663_v62  ;;  %v1022_v62 = vlaneseq }
  0xe3   : > { %v661_v63 = vpop.f32.mrf.mxu2  ;;  %v728_v1 = vpop.f32.mrf.mxu0 }
  0xe4   : > { %v753_v3 = vpop.f32.mrf.mxu1  ;;  %v732_v5 = vadd.f32 %v728_v1, %v687_v2  ;;  %v1023_v63 = vshrl.u32 %v1022_v62, 7  ;;  %v1025_v1 = vand.u32 127, %v1022_v62 }
  0xe5   : > { %v685_v4 = vpop.f32.mrf.mxu3 }
  0xe6   : > { %v757_v6 = vadd.f32 %v753_v3, %v732_v5  ;;  %v2526_v5 = vmov 0.0  }
  0xeb   : > { %v798_v7 = vpop.f32.mrf.mxu2  ;;  %v730_v8 = vpop.f32.mrf.mxu0 }
  0xec   : > { %v802_v9 = vadd.f32 %v798_v7, %v757_v6  ;;  %v755_v10 = vpop.f32.mrf.mxu1 }
  0xed   : > { %v823_v11 = vpop.f32.mrf.mxu3 }
  0xee   : > { %v827_v12 = vadd.f32 %v823_v11, %v802_v9 }
  0xf0   : > { %v828_v13 = vmul.f32 0.00390625, %v827_v12 }
  0xf2   : > { %v830_v15 = vmul.f32 %v2741_v20, %v828_v13 }
  0xf3   : > { %v800_v16 = vpop.f32.mrf.mxu2 }
  0xf4   : > { %v835_v17 = vadd.f32 %v833_v14, %v830_v15 }
  0xf5   : > { %v825_v19 = vpop.f32.mrf.mxu3 }
  0xf6   : > { %2243 = vmatpush.msk.msra.mxu0 %vm845_vm4, %v835_v17  ;;  %2347 = vmatpush.msk.msra.mxu2 %vm845_vm4, %v835_v17 }
  0xf7   : > { %2244 = vmatmul.msk.f32.vlgmr.msra.gmra.mxu0 %vm838_vm5, %v836_v18  ;;  %2245 = vmatmul.msk.f32.vlgmr.msra.gmra.mxu2 %vm838_vm5, %v837_v24 }
 0x174   : > { %v866_v21 = vpop.f32.mrf.mxu0 }
 0x175   : > { %v873_v22 = vrot.slane %v866_v21, 4 }
 0x177   : > { %2246 = vmatpush.xpose.msk.msra.mxu3 %vm874_vm6, %v873_v22 }
 0x17a   : > { %2247 = vmatmul.msk.f32.vlgmr.msra.gmra.mxu3 %vm874_vm6, %v866_v21  ;;  %v869_v30 = vpop.f32.mrf.mxu2 }
 0x17b   : > { %2248 = vmatpush.msk.msrb.mxu2 %vm845_vm4, %v869_v30 }
 0x1fd   : > { %v896_v20 = vpop.f32.mrf.mxu3 }
 0x1fe   : > { %v900_v23 = vsel %vm899_vm7, %v896_v20, -inf }
 0x1ff   : > { %901 = vmax.xlane.f32.xlu0 %v900_v23 }
 0x272   : > { %v902_v25 = vpop.xlane.xlu0 %901 }
 0x273   : > { %v903_v26 = vsub.f32 %v896_v20, %v902_v25 }
 0x275   : > { %v904_v27 = vmul.f32 1.442695, %v903_v26 }
 0x277   : > { %2406 = vpow2.f32 %v904_v27 }
 0x27d   : > { %v2407_v28 = vpop.eup %2406 }
 0x27e   : > { %v906_v29 = vsel %vm899_vm7, %v2407_v28, 0.0 }
 0x27f   : > { %907 = vadd.xlane.f32.xlu1 %v906_v29  ;;  %v1091_v29 = vld [vmem:[%s3120_s5] sm:$0x7] }
 0x2f2   : > { %v908_v31 = vpop.xlane.xlu1 %907 }
 0x2f3   : > { %2408 = vrcp.f32 %v908_v31  ;;  %v920_v34 = vand.u32 2147483648, %v908_v31  ;;  %v918_v36 = vand.u32 2147483647, %v908_v31  ;;  %vm914_vm9 = vweird.f32 %v908_v31 }
 0x2f5   : > { %v921_v38 = vor.u32 1.1754944e-38, %v920_v34  ;;  %vm919_vm11 = vcmp.eq.f32.partialorder %v918_v36, 8.507059e+37  ;;  %v1146_v34 = vld [vmem:[%s2654_s12 + $0x10] sm:$0x1] }
 0x2f9   : > { %v2409_v32 = vpop.eup %2408 }
 0x2fa   : > { %v910_v33 = vmul.f32 %v2409_v32, %v908_v31  ;;  %vm915_vm8 = vweird.f32 %v2409_v32 }
 0x2fb   : > { %vm916_vm10 = vmor %vm914_vm9, %vm915_vm8  ;;  %vm1026_vm8 = vcmp.eq.s32.totalorder %v1023_v63, %v1025_v1 }
 0x2fc   : > { %v911_v0 = vsub.f32 1.0, %v910_v33  ;;  %v1189_v33 = vld [vmem:[%s2654_s12] sm:$0x2] }
 0x2fd   : > { %v1197_v36 = vunpack.c.l.b16 %v1189_v33 }
 0x2fe   : > { %v912_v35 = vmul.f32 %v2409_v32, %v911_v0  ;;  %v1190_v0 = vld [vmem:[%s2654_s12 + $0x8] sm:$0x2] }
 0x300   : > { %v913_v37 = vadd.f32 %v2409_v32, %v912_v35 }
 0x302   : > { %v917_v39 = vsel %vm916_vm10, %v2409_v32, %v913_v37  ;;  %v1144_v32 = vld [vmem:[%s2654_s12] sm:$0x1]  ;;  %v1198_v37 = vunpack.c.l.b16 %v1190_v0 }
 0x303   : > { %v922_v40 = vsel %vm919_vm11, %v921_v38, %v917_v39  ;;  %vm1040_vm11 = vcmask 3072   ;;  %v1152_v35 = vunpack.c.l.b16 %v1144_v32  ;;  %v1234_v38 = vld [vmem:[%s2654_s12] sm:$0x2]  ;;  %v1235_v39 = vld [vmem:[%s2654_s12 + $0x8] sm:$0x2] }
 0x304   : > { %v923_v41 = vmul.f32 %v2407_v28, %v922_v40  ;;  %v1145_v40 = vld [vmem:[%s2654_s12 + $0x8] sm:$0x1]  ;;  %v1242_v44 = vunpack.c.l.b16 %v1234_v38  ;;  %v1328_v38 = vld [vmem:[%s2654_s12 + $0x18] sm:$0x4] }
 0x306   : > { %2249 = vmatmul.msk.f32.vlgmr.msrb.gmra.mxu2 %vm838_vm5, %v923_v41  ;;  %v1147_v41 = vld [vmem:[%s2654_s12 + $0x18] sm:$0x1] }
 0x389   : > { %v947_v43 = vpop.f32.mrf.mxu2 }
 0x38a   : > { %2250 = vmatpush.msk.msrb.mxu3 %vm845_vm4, %v947_v43  ;;  %v1192_v43 = vld [vmem:[%s2654_s12 + $0x18] sm:$0x2] }
 0x38b   : > { %2251 = vmatmul.msk.f32.vlgmr.msrb.gmra.mxu3 %vm838_vm5, %v950_v42  ;;  %v1154_v42 = vunpack.c.l.b16 %v1146_v34  ;;  %v1325_v34 = vld [vmem:[%s2654_s12] sm:$0x4] }
 0x40e   : > { %v974_v45 = vpop.f32.mrf.mxu3 }
 0x40f   : > { %v977_v46 = vsub.f32 0.0, %v974_v45  ;;  %v1243_v45 = vunpack.c.l.b16 %v1235_v39  ;;  %v1333_v39 = vunpack.c.l.b16 %v1325_v34 }
 0x411   : > { %v978_v47 = vmul.f32 1.442695, %v977_v46  ;;  %v1153_v46 = vunpack.c.l.b16 %v1145_v40 }
 0x413   : > { %2410 = vpow2.f32 %v978_v47  ;;  %v1155_v47 = vunpack.c.l.b16 %v1147_v41 }
 0x419   : > { %v2411_v49 = vpop.eup %2410 }
 0x41a   : > { %v980_v50 = vadd.f32 1.0, %v2411_v49  ;;  %v2259_v49 = vunpack.i.l.s16 %v1152_v35  ;;  %v1326_v35 = vld [vmem:[%s2654_s12 + $0x8] sm:$0x4] }
 0x41b   : > { %v1334_v40 = vunpack.c.l.b16 %v1326_v35 }
 0x41c   : > { %2412 = vrcp.f32 %v980_v50  ;;  %v992_v54 = vand.u32 2147483648, %v980_v50  ;;  %v990_v56 = vand.u32 2147483647, %v980_v50  ;;  %vm986_vm13 = vweird.f32 %v980_v50 }
 0x41e   : > { %v993_v58 = vor.u32 1.1754944e-38, %v992_v54  ;;  %vm991_vm15 = vcmp.eq.f32.partialorder %v990_v56, 8.507059e+37  ;;  %v2264_v54 = vunpack.i.l.s16 %v1197_v36  ;;  %v1236_v56 = vld [vmem:[%s2654_s12 + $0x10] sm:$0x2] }
 0x420   : > { %v1209_v1 = vrot.slane %v2264_v54, 2 }
 0x422   : > { %v2413_v51 = vpop.eup %2412 }
 0x423   : > { %v982_v52 = vmul.f32 %v2413_v51, %v980_v50  ;;  %vm987_vm12 = vweird.f32 %v2413_v51  ;;  %v1191_v50 = vld [vmem:[%s2654_s12 + $0x10] sm:$0x2] }
 0x424   : > { %vm988_vm14 = vmor %vm986_vm13, %vm987_vm12 }
 0x425   : > { %v983_v53 = vsub.f32 1.0, %v982_v52  ;;  %v2261_v52 = vunpack.i.l.s16 %v1154_v42 }
 0x427   : > { %v984_v55 = vmul.f32 %v2413_v51, %v983_v53  ;;  %v1199_v53 = vunpack.c.l.b16 %v1191_v50  ;;  %v1166_v62 = vrot.slane %v2261_v52, 7  ;;  %v1371_v50 = vld [vmem:[%s2654_s12] sm:$0x8] }
 0x429   : > { %v985_v57 = vadd.f32 %v2413_v51, %v984_v55  ;;  %v2265_v55 = vunpack.i.l.s16 %v1198_v37  ;;  %v2266_v63 = vunpack.i.l.s16 %v1199_v53  ;;  %v1327_v37 = vld [vmem:[%s2654_s12 + $0x10] sm:$0x4] }
 0x42b   : > { %v989_v59 = vsel %vm988_vm14, %v2413_v51, %v985_v57  ;;  %v1200_v51 = vunpack.c.l.b16 %v1192_v43  ;;  %v2260_v57 = vunpack.i.l.s16 %v1153_v46  ;;  %v1335_v46 = vunpack.c.l.b16 %v1327_v37 }
 0x42c   : > { %v994_v60 = vsel %vm991_vm15, %v993_v58, %v989_v59  ;;  %v2262_v58 = vunpack.i.l.s16 %v1155_v47  ;;  %v1164_v59 = vrot.slane %v2259_v49, 1  ;;  %v1336_v47 = vunpack.c.l.b16 %v1328_v38  ;;  %v1463_v38 = vld [vmem:[%s2654_s12 + $0x4] sm:$0x1] }
 0x42d   : > { %1029 = vperm.xlu1 %2403, %v994_v60   ;;  %2252 = vmatpush.xpose.msk.msra.mxu1 %vm874_vm6, %v994_v60  ;;  %v1062_v28 = vadd.f32 1.0, %v994_v60  ;;  %v2279_v49 = vunpack.i.l.s16 %v1333_v39  ;;  %v1464_v39 = vld [vmem:[%s2654_s12 + $0xc] sm:$0x1]  ;;  %vm1901_vm14 = vcmask 1045509   ;;  %vm1904_vm15 = vcmask 1046534  }
 0x430   : > { %2253 = vmatmul.msk.f32.vlgmr.msra.gmra.mxu1 %vm874_vm6, %v2525_v61 }
 0x49f   : > { %v1030_v4 = vpop.permute.xlu1 %1029 }
 0x4ad   : > { %v1019_v2 = vpop.f32.mrf.mxu1 }
 0x4ae   : > { %v1027_v3 = vperm.slane %v1019_v2, 0  ;;  %v1210_v2 = vrot.slane %v2265_v55, 1  ;;  %v2280_v55 = vunpack.i.l.s16 %v1334_v40 }
 0x4b0   : > { %vm1032_vm9 = vcmp.le.f32.partialorder %v1027_v3, %v1030_v4  ;;  %v1165_v3 = vsel %vm295_vm0, %v2260_v57, %v1164_v59  ;;  %v1168_v4 = vrot.slane %v2262_v58, 6  ;;  %v2281_v58 = vunpack.i.l.s16 %v1335_v46 }
 0x4b1   : > { %vm1033_vm10 = vmor %vm1026_vm8, %vm1032_vm9  ;;  %v2282_v59 = vunpack.i.l.s16 %v1336_v47  ;;  %v1471_v46 = vunpack.c.l.b16 %v1463_v38  ;;  %v1472_v47 = vunpack.c.l.b16 %v1464_v39  ;;  %v1601_v38 = vld [vmem:[%s2654_s12 + $0x1c] sm:$0x2]  ;;  %vm1907_vm8 = vcmask 1047559  }
 0x4b2   : > { %v1034_v6 = vsel %vm1033_vm10, 1.0, %v2526_v5 }
 0x4b3   : > { %v1035_v7 = vsel %vm899_vm7, %v1034_v6, 0.0  ;;  %v1244_v6 = vunpack.c.l.b16 %v1236_v56  ;;  %v1373_v56 = vld [vmem:[%s2654_s12 + $0x10] sm:$0x8] }
 0x4b4   : > { %1036 = vadd.xlane.f32.xlu2 %v1035_v7  ;;  %v1167_v7 = vsel %vm298_vm1, %v1166_v62, %v1165_v3 }
 0x527   : > { %v1037_v8 = vpop.xlane.xlu2 %1036 }
 0x528   : > { %vm1038_vm12 = vcmp.ge.f32.partialorder %v1037_v8, 1.0  ;;  %vm1048_vm13 = vcmp.ge.f32.partialorder %v1037_v8, 2.0  ;;  %v1211_v8 = vsel %vm295_vm0, %v1210_v2, %v1209_v1  ;;  %v1379_v1 = vunpack.c.l.b16 %v1371_v50  ;;  %v1508_v50 = vld [vmem:[%s2654_s12 + $0x4] sm:$0x1] }
 0x529   : > { %v1039_v9 = vsel %vm1038_vm12, %v994_v60, inf  ;;  %v1049_v10 = vsel %vm1048_vm13, %v994_v60, inf }
 0x52a   : > { %v1041_v11 = vsel %vm1040_vm11, %v1039_v9, inf  ;;  %v1050_v12 = vsel %vm1040_vm11, %v1049_v10, inf  ;;  %v2269_v10 = vunpack.i.l.s16 %v1242_v44 }
 0x52b   : > { %v1042_v13 = vrot.slane %v1041_v11, 4  ;;  %v1051_v14 = vrot.slane %v1050_v12, 4 }
 0x52d   : > { %v1043_v15 = vmin.f32 %v1041_v11, %v1042_v13  ;;  %v1052_v16 = vmin.f32 %v1050_v12, %v1051_v14  ;;  %v1169_v11 = vsel %vm301_vm2, %v1168_v4, %v1167_v7  ;;  %v1212_v12 = vsel %vm298_vm1, %v2266_v63, %v1211_v8  ;;  %v1417_v7 = vld [vmem:[%s2654_s12] sm:$0x8] }
 0x52e   : > { %v2270_v13 = vunpack.i.l.s16 %v1243_v45  ;;  %v2271_v14 = vunpack.i.l.s16 %v1244_v6  ;;  %v1346_v63 = vrot.slane %v2280_v55, 4  ;;  %v1348_v4 = vrot.slane %v2281_v58, 3  ;;  %v1510_v55 = vld [vmem:[%s2654_s12 + $0x14] sm:$0x1] }
 0x52f   : > { %v1044_v17 = vrot.slane %v1043_v15, 2  ;;  %v1053_v18 = vrot.slane %v1052_v16, 2  ;;  %v1381_v6 = vunpack.c.l.b16 %v1373_v56  ;;  %v1511_v56 = vld [vmem:[%s2654_s12 + $0x1c] sm:$0x1] }
 0x531   : > { %v1045_v19 = vmin.f32 %v1043_v15, %v1044_v17  ;;  %v1054_v21 = vmin.f32 %v1052_v16, %v1053_v18  ;;  %v1170_v15 = vpack.c.b16 %v1169_v11, %v1169_v11  ;;  %v1254_v18 = vrot.slane %v2269_v10, 3 }
 0x532   : > { %v2284_v11 = vunpack.i.l.s16 %v1379_v1 }
 0x533   : > { %v1046_v22 = vrot.slane %v1045_v19, 1  ;;  %v1055_v20 = vrot.slane %v1054_v21, 1 }
 0x535   : > { %v1047_v23 = vmin.f32 %v1045_v19, %v1046_v22  ;;  %v1056_v24 = vmin.f32 %v1054_v21, %v1055_v20  ;;  %v1255_v21 = vrot.slane %v2270_v13, 2  ;;  %v1257_v22 = vrot.slane %v2271_v14, 1 }
 0x537   : > { %v1057_v25 = vsub.f32 %v1056_v24, %v1047_v23 }
 0x539   : > { %v1058_v26 = vmul.f32 0.3, %v1057_v25  ;;  %v1256_v25 = vsel %vm295_vm0, %v1255_v21, %v1254_v18  ;;  %v1420_v18 = vld [vmem:[%s2654_s12 + $0x18] sm:$0x8] }
 0x53b   : > { %v1059_v27 = vadd.f32 %v1058_v26, %v1047_v23  ;;  %v1258_v26 = vsel %vm298_vm1, %v1257_v22, %v1256_v25  ;;  %v1391_v22 = vrot.slane %v2284_v11, 6 }
 0x53d   : > { %vm1060_vm7 = vcmp.le.f32.partialorder %v994_v60, %v1059_v27 }
 0x53e   : > { %v1061_v30 = vsel %vm1060_vm7, 0.0, %v994_v60  ;;  %v2267_v60 = vunpack.i.l.s16 %v1200_v51  ;;  %v1372_v51 = vld [vmem:[%s2654_s12 + $0x8] sm:$0x8] }
 0x53f   : > { %v1063_v31 = vmul.f32 %v1062_v28, %v1061_v30  ;;  %2256 = vmatpush.msk.msra.mxu3 %vm845_vm4, %v1061_v30  ;;  %vm1126_vm4 = vcmask 1041408   ;;  %v1279_v28 = vld [vmem:[%s2654_s12] sm:$0x4]  ;;  %v1380_v2 = vunpack.c.l.b16 %v1372_v51  ;;  %v1509_v51 = vld [vmem:[%s2654_s12 + $0xc] sm:$0x1] }
 0x540   : > { %2257 = vmatmul.msk.f32.vlgmr.msra.gmra.mxu3 %vm838_vm5, %v1091_v29  ;;  %v1213_v5 = vrot.slane %v2267_v60, 7  ;;  %v1127_v20 = vsel %vm1126_vm4, %v2687_v48, 0  ;;  %v1172_v23 = vsel %vm1126_vm4, %v1170_v15, 0  ;;  %v1280_v29 = vld [vmem:[%s2654_s12 + $0x8] sm:$0x4]  ;;  %v1287_v32 = vunpack.c.l.b16 %v1279_v28 }
 0x541   : > { %2254 = vmatpush.xpose.msk.msra.mxu2 %vm874_vm6, %v1063_v31  ;;  %1136 = vmatpush.bf16.msrb.mxu0 %v1127_v20  ;;  %v1281_v48 = vld [vmem:[%s2654_s12 + $0x10] sm:$0x4]  ;;  %v1282_v31 = vld [vmem:[%s2654_s12 + $0x18] sm:$0x4]  ;;  %v1288_v33 = vunpack.c.l.b16 %v1280_v29  ;;  %v1345_v60 = vrot.slane %v2279_v49, 5  ;;  %v2285_v14 = vunpack.i.l.s16 %v1380_v2  ;;  %v2286_v15 = vunpack.i.l.s16 %v1381_v6 }
 0x542   : > { %v1214_v16 = vsel %vm301_vm2, %v1213_v5, %v1212_v12  ;;  %1181 = vmatpush.bf16.msrb.mxu1 %v1172_v23  ;;  %v1289_v0 = vunpack.c.l.b16 %v1281_v48  ;;  %v1290_v36 = vunpack.c.l.b16 %v1282_v31  ;;  %v2274_v42 = vunpack.i.l.s16 %v1287_v32 }
 0x543   : > { %v1215_v19 = vpack.c.b16 %v1214_v16, %v1214_v16  ;;  %v2275_v43 = vunpack.i.l.s16 %v1288_v33  ;;  %v1350_v5 = vrot.slane %v2282_v59, 2  ;;  %v1418_v16 = vld [vmem:[%s2654_s12 + $0x8] sm:$0x8]  ;;  %v1425_v20 = vunpack.c.l.b16 %v1417_v7 }
 0x544   : > { %2255 = vmatmul.msk.f32.vlgmr.msra.gmra.mxu2 %vm874_vm6, %v2525_v61  ;;  %v1237_v61 = vld [vmem:[%s2654_s12 + $0x18] sm:$0x2]  ;;  %v2276_v44 = vunpack.i.l.s16 %v1289_v0  ;;  %v2277_v45 = vunpack.i.l.s16 %v1290_v36  ;;  %v1299_v52 = vrot.slane %v2274_v42, 4  ;;  %v1392_v25 = vrot.slane %v2285_v14, 5 }
 0x545   : > { %v1245_v9 = vunpack.c.l.b16 %v1237_v61  ;;  %v1217_v24 = vsel %vm1126_vm4, %v1215_v19, 0  ;;  %v1300_v53 = vrot.slane %v2275_v43, 3  ;;  %v1374_v61 = vld [vmem:[%s2654_s12 + $0x18] sm:$0x8]  ;;  %v1426_v28 = vunpack.c.l.b16 %v1418_v16 }
 0x546   : > { %1226 = vmatpush.bf16.msrb.mxu2 %v1217_v24  ;;  %v1302_v54 = vrot.slane %v2276_v44, 2  ;;  %v1304_v57 = vrot.slane %v2277_v45, 1  ;;  %v1382_v10 = vunpack.c.l.b16 %v1374_v61  ;;  %v1428_v48 = vunpack.c.l.b16 %v1420_v18  ;;  %v1465_v44 = vld [vmem:[%s2654_s12 + $0x14] sm:$0x1]  ;;  %v1466_v45 = vld [vmem:[%s2654_s12 + $0x1c] sm:$0x1] }
 0x547   : > { %v2272_v17 = vunpack.i.l.s16 %v1245_v9  ;;  %v1301_v62 = vsel %vm295_vm0, %v1300_v53, %v1299_v52  ;;  %v1347_v9 = vsel %vm295_vm0, %v1346_v63, %v1345_v60  ;;  %v1393_v31 = vsel %vm295_vm0, %v1392_v25, %v1391_v22 }
 0x548   : > { %v1303_v3 = vsel %vm298_vm1, %v1302_v54, %v1301_v62  ;;  %v1349_v13 = vsel %vm298_vm1, %v1348_v4, %v1347_v9  ;;  %v2287_v21 = vunpack.i.l.s16 %v1382_v10  ;;  %v2289_v32 = vunpack.i.l.s16 %v1425_v20 }
 0x549   : > { %v1259_v27 = vsel %vm301_vm2, %v2272_v17, %v1258_v26  ;;  %v1305_v8 = vsel %vm301_vm2, %v1304_v57, %v1303_v3  ;;  %v1419_v17 = vld [vmem:[%s2654_s12 + $0x10] sm:$0x8]  ;;  %v1351_v19 = vsel %vm301_vm2, %v1350_v5, %v1349_v13  ;;  %v1394_v26 = vrot.slane %v2286_v15, 4  ;;  %v1553_v3 = vld [vmem:[%s2654_s12 + $0x4] sm:$0x2] }
 0x54a   : > { %v1260_v30 = vpack.c.b16 %v1259_v27, %v1259_v27  ;;  %v1306_v12 = vpack.c.b16 %v1305_v8, %v1305_v8  ;;  %v1352_v24 = vpack.c.b16 %v1351_v19, %v1351_v19  ;;  %v1396_v27 = vrot.slane %v2287_v21, 3  ;;  %v1555_v13 = vld [vmem:[%s2654_s12 + $0x14] sm:$0x2]  ;;  %v1087_v15 = vld [vmem:[%s3119_s4] sm:$0x7] }
 0x54b   : > { %v1427_v29 = vunpack.c.l.b16 %v1419_v17  ;;  %v1395_v33 = vsel %vm298_vm1, %v1394_v26, %v1393_v31  ;;  %v2290_v0 = vunpack.i.l.s16 %v1426_v28  ;;  %v2292_v35 = vunpack.i.l.s16 %v1428_v48  ;;  %v1556_v19 = vld [vmem:[%s2654_s12 + $0x1c] sm:$0x2] }
 0x54c   : > { %v1262_v41 = vsel %vm1126_vm4, %v1260_v30, 0  ;;  %v1308_v23 = vsel %vm1126_vm4, %v1306_v12, 0  ;;  %v1354_v30 = vsel %vm1126_vm4, %v1352_v24, 0  ;;  %v1397_v36 = vsel %vm301_vm2, %v1396_v27, %v1395_v33  ;;  %v1554_v12 = vld [vmem:[%s2654_s12 + $0xc] sm:$0x2] }
 0x54d   : > { %1271 = vmatpush.bf16.msrb.mxu3 %v1262_v41  ;;  %1317 = vmatpush.bf16.msra.mxu0 %v1308_v23  ;;  %v2291_v34 = vunpack.i.l.s16 %v1427_v29  ;;  %v1437_v37 = vrot.slane %v2289_v32, 7  ;;  %v1398_v40 = vpack.c.b16 %v1397_v36, %v1397_v36  ;;  %v1438_v41 = vrot.slane %v2290_v0, 6  ;;  %v1598_v32 = vld [vmem:[%s2654_s12 + $0x4] sm:$0x2]  ;;  %v1599_v36 = vld [vmem:[%s2654_s12 + $0xc] sm:$0x2] }
 0x54e   : > { %1363 = vmatpush.bf16.msra.mxu1 %v1354_v30  ;;  %v1442_v43 = vrot.slane %v2292_v35, 4  ;;  %v1473_v49 = vunpack.c.l.b16 %v1465_v44  ;;  %v1474_v54 = vunpack.c.l.b16 %v1466_v45  ;;  %v1516_v57 = vunpack.c.l.b16 %v1508_v50 }
 0x54f   : > { %v1440_v42 = vrot.slane %v2291_v34, 5  ;;  %v1400_v52 = vsel %vm1126_vm4, %v1398_v40, 0  ;;  %v1439_v53 = vsel %vm295_vm0, %v1438_v41, %v1437_v37  ;;  %v2294_v59 = vunpack.i.l.s16 %v1471_v46  ;;  %v1600_v37 = vld [vmem:[%s2654_s12 + $0x14] sm:$0x2] }
 0x550   : > { %1409 = vmatpush.bf16.msra.mxu2 %v1400_v52  ;;  %v2295_v60 = vunpack.i.l.s16 %v1472_v47  ;;  %v2296_v61 = vunpack.i.l.s16 %v1473_v49  ;;  %v2297_v63 = vunpack.i.l.s16 %v1474_v54  ;;  %v1517_v1 = vunpack.c.l.b16 %v1509_v51 }
 0x551   : > { %v1441_v58 = vsel %vm298_vm1, %v1440_v42, %v1439_v53  ;;  %v1518_v2 = vunpack.c.l.b16 %v1510_v55  ;;  %v1519_v7 = vunpack.c.l.b16 %v1511_v56  ;;  %v2299_v9 = vunpack.i.l.s16 %v1516_v57  ;;  %v1643_v56 = vld [vmem:[%s2654_s12 + $0x4] sm:$0x4]  ;;  %v1644_v57 = vld [vmem:[%s2654_s12 + $0xc] sm:$0x4] }
 0x552   : > { %v1443_v62 = vsel %vm301_vm2, %v1442_v43, %v1441_v58  ;;  %v1483_v5 = vrot.slane %v2295_v60, 7  ;;  %v1485_v6 = vrot.slane %v2296_v61, 6  ;;  %v1487_v8 = vrot.slane %v2297_v63, 5  ;;  %v1646_v63 = vld [vmem:[%s2654_s12 + $0x1c] sm:$0x4] }
 0x553   : > { %v1444_v4 = vpack.c.b16 %v1443_v62, %v1443_v62  ;;  %v2300_v10 = vunpack.i.l.s16 %v1517_v1  ;;  %v2301_v11 = vunpack.i.l.s16 %v1518_v2  ;;  %v2302_v18 = vunpack.i.l.s16 %v1519_v7  ;;  %v1645_v62 = vld [vmem:[%s2654_s12 + $0x14] sm:$0x4]  ;;  %v1689_v1 = vld [vmem:[%s2654_s12 + $0x4] sm:$0x4] }
 0x554   : > { %v1484_v17 = vsel %vm295_vm0, %v1483_v5, %v2294_v59  ;;  %v1561_v21 = vunpack.c.l.b16 %v1553_v3  ;;  %v1528_v23 = vrot.slane %v2299_v9, 1  ;;  %v1562_v27 = vunpack.c.l.b16 %v1554_v12 }
 0x555   : > { %v1446_v16 = vsel %vm1126_vm4, %v1444_v4, 0  ;;  %v1486_v20 = vsel %vm298_vm1, %v1485_v6, %v1484_v17  ;;  %v1530_v24 = vrot.slane %v2301_v11, 7  ;;  %v1532_v26 = vrot.slane %v2302_v18, 6  ;;  %v1690_v6 = vld [vmem:[%s2654_s12 + $0xc] sm:$0x4] }
 0x556   : > { %1455 = vmatpush.bf16.msra.mxu3 %v1446_v16  ;;  %v1488_v25 = vsel %vm301_vm2, %v1487_v8, %v1486_v20  ;;  %v1563_v28 = vunpack.c.l.b16 %v1555_v13  ;;  %v1529_v30 = vsel %vm295_vm0, %v2300_v10, %v1528_v23  ;;  %v1564_v31 = vunpack.c.l.b16 %v1556_v19 }
 0x557   : > { %v1489_v48 = vpack.c.b16 %v1488_v25, %v1488_v25  ;;  %v1531_v33 = vsel %vm298_vm1, %v1530_v24, %v1529_v30  ;;  %v2304_v0 = vunpack.i.l.s16 %v1561_v21  ;;  %v2305_v34 = vunpack.i.l.s16 %v1562_v27 }
 0x558   : > { %v2306_v35 = vunpack.i.l.s16 %v1563_v28  ;;  %v1533_v41 = vsel %vm301_vm2, %v1532_v26, %v1531_v33  ;;  %v2307_v42 = vunpack.i.l.s16 %v1564_v31  ;;  %v1606_v46 = vunpack.c.l.b16 %v1598_v32 }
 0x559   : > { %v1491_v40 = vsel %vm1126_vm4, %v1489_v48, 0  ;;  %v1534_v43 = vpack.c.b16 %v1533_v41, %v1533_v41  ;;  %v1573_v44 = vrot.slane %v2304_v0, 2  ;;  %v1574_v45 = vrot.slane %v2305_v34, 1 }
 0x55a   : > { %v1577_v47 = vrot.slane %v2307_v42, 7  ;;  %v1607_v49 = vunpack.c.l.b16 %v1599_v36  ;;  %v1608_v50 = vunpack.c.l.b16 %v1600_v37  ;;  %v1609_v51 = vunpack.c.l.b16 %v1601_v38  ;;  %v1736_v36 = vld [vmem:[%s2654_s12 + $0xc] sm:$0x8]  ;;  %v1737_v37 = vld [vmem:[%s2654_s12 + $0x14] sm:$0x8] }
 0x55b   : > { %v1536_v52 = vsel %vm1126_vm4, %v1534_v43, 0  ;;  %v1575_v53 = vsel %vm295_vm0, %v1574_v45, %v1573_v44  ;;  %v2309_v54 = vunpack.i.l.s16 %v1606_v46  ;;  %v1651_v4 = vunpack.c.l.b16 %v1643_v56  ;;  %v1738_v38 = vld [vmem:[%s2654_s12 + $0x1c] sm:$0x8]  ;;  %v1781_v44 = vld [vmem:[%s2654_s12 + $0x4] sm:$0x8] }
 0x55c   : > { %v1576_v58 = vsel %vm298_vm1, %v2306_v35, %v1575_v53  ;;  %v2310_v59 = vunpack.i.l.s16 %v1607_v49  ;;  %v2311_v60 = vunpack.i.l.s16 %v1608_v50  ;;  %v2312_v61 = vunpack.i.l.s16 %v1609_v51  ;;  %v1782_v45 = vld [vmem:[%s2654_s12 + $0xc] sm:$0x8]  ;;  %v1784_v56 = vld [vmem:[%s2654_s12 + $0x1c] sm:$0x8] }
 0x55d   : > { %v1578_v2 = vsel %vm301_vm2, %v1577_v47, %v1576_v58  ;;  %v1618_v3 = vrot.slane %v2309_v54, 3  ;;  %v1652_v5 = vunpack.c.l.b16 %v1644_v57  ;;  %v1653_v10 = vunpack.c.l.b16 %v1645_v62 }
 0x55e   : > { %v1579_v7 = vpack.c.b16 %v1578_v2, %v1578_v2  ;;  %v1619_v8 = vrot.slane %v2310_v59, 2  ;;  %v1621_v9 = vrot.slane %v2311_v60, 1  ;;  %v1654_v11 = vunpack.c.l.b16 %v1646_v63 }
 0x55f   : > { %v2314_v12 = vunpack.i.l.s16 %v1651_v4  ;;  %v2315_v13 = vunpack.i.l.s16 %v1652_v5  ;;  %v1697_v16 = vunpack.c.l.b16 %v1689_v1  ;;  %v2316_v19 = vunpack.i.l.s16 %v1653_v10 }
 0x560   : > { %v1581_v17 = vsel %vm1126_vm4, %v1579_v7, 0  ;;  %v1620_v18 = vsel %vm295_vm0, %v1619_v8, %v1618_v3  ;;  %v1698_v21 = vunpack.c.l.b16 %v1690_v6  ;;  %v2317_v20 = vunpack.i.l.s16 %v1654_v11 }
 0x561   : > { %v1663_v23 = vrot.slane %v2314_v12, 4  ;;  %v1664_v24 = vrot.slane %v2315_v13, 3  ;;  %v1666_v26 = vrot.slane %v2316_v19, 2  ;;  %v2319_v32 = vunpack.i.l.s16 %v1697_v16 }
 0x562   : > { %v1668_v31 = vrot.slane %v2317_v20, 1  ;;  %v2320_v0 = vunpack.i.l.s16 %v1698_v21  ;;  %v1744_v51 = vunpack.c.l.b16 %v1736_v36  ;;  %v1746_v53 = vunpack.c.l.b16 %v1738_v38 }
 0x563   : > { %v1665_v30 = vsel %vm295_vm0, %v1664_v24, %v1663_v23  ;;  %v1709_v42 = vrot.slane %v2319_v32, 5  ;;  %v1789_v59 = vunpack.c.l.b16 %v1781_v44  ;;  %v1790_v60 = vunpack.c.l.b16 %v1782_v45 }
 0x564   : > { %v1667_v33 = vsel %vm298_vm1, %v1666_v26, %v1665_v30  ;;  %v1710_v47 = vrot.slane %v2320_v0, 4  ;;  %v2325_v62 = vunpack.i.l.s16 %v1744_v51  ;;  %v2327_v1 = vunpack.i.l.s16 %v1746_v53 }
 0x565   : > { %v1669_v41 = vsel %vm301_vm2, %v1668_v31, %v1667_v33  ;;  %v1792_v5 = vunpack.c.l.b16 %v1784_v56  ;;  %v2329_v10 = vunpack.i.l.s16 %v1789_v59  ;;  %v2330_v11 = vunpack.i.l.s16 %v1790_v60 }
 0x566   : > { %v1670_v46 = vpack.c.b16 %v1669_v41, %v1669_v41  ;;  %v1711_v58 = vsel %vm295_vm0, %v1710_v47, %v1709_v42  ;;  %v1756_v7 = vrot.slane %v2325_v62, 5  ;;  %vm1142_vm6 = vcmask 124928  }
 0x567   : > { %v2332_v13 = vunpack.i.l.s16 %v1792_v5 }
 0x568   : > { %v1672_v57 = vsel %vm1126_vm4, %v1670_v46, 0 }
 0x5c3   : > { %v1115_v55 = vpop.f32.mrf.mxu3 }
 0x5c4   : > { %1120 = vperm.xlu2 %2404, %v1115_v55   ;;  %v1783_v55 = vld [vmem:[%s2654_s12 + $0x14] sm:$0x8] }
 0x5c5   : > { %v1791_v4 = vunpack.c.l.b16 %v1783_v55 }
 0x5c7   : > { %v1084_v14 = vpop.f32.mrf.mxu2  ;;  %v2331_v12 = vunpack.i.l.s16 %v1791_v4 }
 0x5c8   : > { %v1088_v22 = vperm.slane %v1084_v14, 0  ;;  %v1691_v14 = vld [vmem:[%s2654_s12 + $0x14] sm:$0x4] }
 0x5c9   : > { %v1699_v27 = vunpack.c.l.b16 %v1691_v14  ;;  %v1804_v19 = vrot.slane %v2331_v12, 5 }
 0x5ca   : > { %v1089_v29 = vmul.f32 %v1088_v22, %v1087_v15  ;;  %v1692_v15 = vld [vmem:[%s2654_s12 + $0x1c] sm:$0x4]  ;;  %v1622_v22 = vsel %vm298_vm1, %v1621_v9, %v1620_v18  ;;  %v1760_v9 = vrot.slane %v2327_v1, 3  ;;  %v1802_v18 = vrot.slane %v2330_v11, 6 }
 0x5cb   : > { %v1623_v25 = vsel %vm301_vm2, %v2312_v61, %v1622_v22  ;;  %v1700_v28 = vunpack.c.l.b16 %v1692_v15  ;;  %v2321_v34 = vunpack.i.l.s16 %v1699_v27  ;;  %v1806_v22 = vrot.slane %v2332_v13, 4 }
 0x5cc   : > { %v2895_v39 = vpack.c.bf16 %v1089_v29, %v1089_v29  ;;  %v1735_v29 = vld [vmem:[%s2654_s12 + $0x4] sm:$0x8]  ;;  %v1624_v48 = vpack.c.b16 %v1623_v25, %v1623_v25  ;;  %s2194_s12 = sshll.u32 %s2650_s18, 4 }
 0x5cd   : > { %v2322_v35 = vunpack.i.l.s16 %v1700_v28  ;;  %v1743_v43 = vunpack.c.l.b16 %v1735_v29  ;;  %v1712_v49 = vrot.slane %v2321_v34, 3  ;;  %s271_s17 = scalar_lea.vmem [#allocation6], %s2194_s12 }
 0x5ce   : > { %2258 = vmatmul.msk.bf16.vlgmr.msrb.gmra.mxu0 %vm838_vm5, %v2895_v39  ;;  %2263 = vmatmul.msk.bf16.vlgmr.msrb.gmra.mxu1 %vm838_vm5, %v2895_v39  ;;  %s2110_s13 = sshll.u32 %s271_s17, 4  ;;  %s2111_s13 = int_to_ptr.vmem [resolvable:$true] %s2110_s13 }
 0x5cf   : > { %2268 = vmatmul.msk.bf16.vlgmr.msrb.gmra.mxu2 %vm838_vm5, %v2895_v39  ;;  %2273 = vmatmul.msk.bf16.vlgmr.msrb.gmra.mxu3 %vm838_vm5, %v2895_v39  ;;  %v1714_v50 = vrot.slane %v2322_v35, 2  ;;  %v2324_v54 = vunpack.i.l.s16 %v1743_v43  ;;  %v1713_v61 = vsel %vm298_vm1, %v1712_v49, %v1711_v58 }
 0x5d0   : > { %1500 = vmatpush.bf16.msrb.mxu0 %v1491_v40  ;;  %1545 = vmatpush.bf16.msrb.mxu1 %v1536_v52  ;;  %v1626_v40 = vsel %vm1126_vm4, %v1624_v48, 0  ;;  %v1745_v52 = vunpack.c.l.b16 %v1737_v37 }
 0x5d1   : > { %1590 = vmatpush.bf16.msrb.mxu2 %v1581_v17  ;;  %1635 = vmatpush.bf16.msrb.mxu3 %v1626_v40  ;;  %v1715_v2 = vsel %vm301_vm2, %v1714_v50, %v1713_v61  ;;  %v1755_v3 = vrot.slane %v2324_v54, 6  ;;  %v1801_v17 = vrot.slane %v2329_v10, 7 }
 0x5d2   : > { %v2326_v63 = vunpack.i.l.s16 %v1745_v52  ;;  %v1716_v6 = vpack.c.b16 %v1715_v2, %v1715_v2 }
 0x5d3   : > { %v1757_v15 = vsel %vm295_vm0, %v1756_v7, %v1755_v3  ;;  %v1803_v23 = vsel %vm295_vm0, %v1802_v18, %v1801_v17 }
 0x5d4   : > { %v1758_v8 = vrot.slane %v2326_v63, 4  ;;  %v1718_v14 = vsel %vm1126_vm4, %v1716_v6, 0  ;;  %v1805_v24 = vsel %vm298_vm1, %v1804_v19, %v1803_v23 }
 0x5d5   : > { %v1807_v26 = vsel %vm301_vm2, %v1806_v22, %v1805_v24 }
 0x5d6   : > { %v1759_v16 = vsel %vm298_vm1, %v1758_v8, %v1757_v15  ;;  %v1808_v27 = vpack.c.b16 %v1807_v26, %v1807_v26 }
 0x5d7   : > { %v1761_v21 = vsel %vm301_vm2, %v1760_v9, %v1759_v16 }
 0x5d8   : > { %v1762_v20 = vpack.c.b16 %v1761_v21, %v1761_v21  ;;  %v1810_v28 = vsel %vm1126_vm4, %v1808_v27, 0 }
 0x5da   : > { %v1764_v25 = vsel %vm1126_vm4, %v1762_v20, 0 }
 0x5de   : > { %2278 = vmatmul.msk.bf16.vlgmr.msra.gmra.mxu0 %vm838_vm5, %v2895_v39  ;;  %2283 = vmatmul.msk.bf16.vlgmr.msra.gmra.mxu1 %vm838_vm5, %v2895_v39 }
 0x5df   : > { %2288 = vmatmul.msk.bf16.vlgmr.msra.gmra.mxu2 %vm838_vm5, %v2895_v39  ;;  %2293 = vmatmul.msk.bf16.vlgmr.msra.gmra.mxu3 %vm838_vm5, %v2895_v39 }
 0x5e0   : > { %1681 = vmatpush.bf16.msra.mxu0 %v1672_v57  ;;  %1727 = vmatpush.bf16.msra.mxu1 %v1718_v14 }
 0x5e1   : > { %1773 = vmatpush.bf16.msra.mxu2 %v1764_v25  ;;  %1819 = vmatpush.bf16.msra.mxu3 %v1810_v28 }
 0x5ee   : > { %2298 = vmatmul.msk.bf16.vlgmr.msrb.gmra.mxu0 %vm838_vm5, %v2895_v39  ;;  %2303 = vmatmul.msk.bf16.vlgmr.msrb.gmra.mxu1 %vm838_vm5, %v2895_v39 }
 0x5ef   : > { %2308 = vmatmul.msk.bf16.vlgmr.msrb.gmra.mxu2 %vm838_vm5, %v2895_v39  ;;  %2313 = vmatmul.msk.bf16.vlgmr.msrb.gmra.mxu3 %vm838_vm5, %v2895_v39 }
 0x5fe   : > { %2318 = vmatmul.msk.bf16.vlgmr.msra.gmra.mxu0 %vm838_vm5, %v2895_v39  ;;  %2323 = vmatmul.msk.bf16.vlgmr.msra.gmra.mxu1 %vm838_vm5, %v2895_v39 }
 0x5ff   : > { %2328 = vmatmul.msk.bf16.vlgmr.msra.gmra.mxu2 %vm838_vm5, %v2895_v39  ;;  %2333 = vmatmul.msk.bf16.vlgmr.msra.gmra.mxu3 %vm838_vm5, %v2895_v39  ;;  %vm1898_vm5 = vcmask 1044484  }
 0x61e   : > { %v2972_v29 = vpop.permute.xlu2 %1120 }
 0x64b   : > { %v1138_v48 = vpop.f32.mrf.mxu0  ;;  %v1183_v30 = vpop.f32.mrf.mxu1 }
 0x64c   : > { %v1139_v31 = vadd.f32 %v1138_v48, %v2972_v29  ;;  %v1184_v32 = vadd.f32 %v1183_v30, %v2972_v29 }
 0x64e   : > { %1143 = vst.msk [vmem:[#allocation2] sm:$0x7] %vm1142_vm6, %v1139_v31 }
 0x64f   : > { %1188 = vst.msk [vmem:[#allocation2 + $0x4] sm:$0x7] %vm1142_vm6, %v1184_v32 }
 0x652   : > { %v1228_v33 = vpop.f32.mrf.mxu2  ;;  %v1273_v0 = vpop.f32.mrf.mxu3 }
 0x653   : > { %v1229_v34 = vadd.f32 %v1228_v33, %v2972_v29  ;;  %v1274_v35 = vadd.f32 %v1273_v0, %v2972_v29  ;;  %v1140_v39 = vpop.f32.mrf.mxu0  ;;  %v1185_v36 = vpop.f32.mrf.mxu1 }
 0x655   : > { %1233 = vst.msk [vmem:[#allocation2 + $0x8] sm:$0x7] %vm1142_vm6, %v1229_v34  ;;  %v1859_v16 = vld [vmem:[#allocation2 + $0x2] sm:$0x1]  ;;  %v1843_v18 = vld [vmem:[#allocation2 + $0x1] sm:$0x1] }
 0x656   : > { %1278 = vst.msk [vmem:[#allocation2 + $0xc] sm:$0x7] %vm1142_vm6, %v1274_v35  ;;  %v1860_v63 = vld [vmem:[#allocation2 + $0x6] sm:$0x1]  ;;  %v1844_v1 = vld [vmem:[#allocation2 + $0x5] sm:$0x1] }
 0x657   : > { %v2998_v2 = vld [vmem:[#allocation2 + $0x4] sm:$0x1]  ;;  %v2036_v9 = vrot.slane %v1860_v63, 7  ;;  %v1939_v13 = vrot.slane %v1844_v1, 7 }
 0x658   : > { %v1891_v15 = vrot.slane %v2998_v2, 7 }
 0x659   : > { %v2037_v28 = vsel %vm295_vm0, %v2036_v9, %v1859_v16  ;;  %v1940_v30 = vsel %vm295_vm0, %v1939_v13, %v1843_v18 }
 0x65a   : > { %v1230_v37 = vpop.f32.mrf.mxu2  ;;  %v1275_v38 = vpop.f32.mrf.mxu3 }
 0x65b   : > { %v1319_v40 = vpop.f32.mrf.mxu0  ;;  %v1365_v41 = vpop.f32.mrf.mxu1 }
 0x65c   : > { %v1320_v42 = vadd.f32 %v1319_v40, %v2972_v29  ;;  %v1366_v43 = vadd.f32 %v1365_v41, %v2972_v29  ;;  %v1861_v5 = vld [vmem:[#allocation2 + $0xa] sm:$0x1]  ;;  %v1845_v6 = vld [vmem:[#allocation2 + $0x9] sm:$0x1]  ;;  %v1829_v14 = vld [vmem:[#allocation2 + $0x8] sm:$0x1] }
 0x65d   : > { %v1862_v12 = vld [vmem:[#allocation2 + $0xe] sm:$0x1]  ;;  %v2038_v17 = vrot.slane %v1861_v5, 6  ;;  %v1846_v19 = vld [vmem:[#allocation2 + $0xd] sm:$0x1]  ;;  %v1941_v21 = vrot.slane %v1845_v6, 6 }
 0x65e   : > { %1324 = vst.msk [vmem:[#allocation2 + $0x10] sm:$0x7] %vm1142_vm6, %v1320_v42  ;;  %v3003_v22 = vld [vmem:[#allocation2 + $0xc] sm:$0x1]  ;;  %v2040_v48 = vrot.slane %v1862_v12, 5  ;;  %v1943_v31 = vrot.slane %v1846_v19, 5 }
 0x65f   : > { %1370 = vst.msk [vmem:[#allocation2 + $0x14] sm:$0x7] %vm1142_vm6, %v1366_v43  ;;  %v2039_v32 = vsel %vm298_vm1, %v2038_v17, %v2037_v28  ;;  %v1942_v33 = vsel %vm298_vm1, %v1941_v21, %v1940_v30  ;;  %v1893_v0 = vrot.slane %v1829_v14, 6  ;;  %v1895_v34 = vrot.slane %v3003_v22, 5  ;;  %v1827_v41 = vld [vmem:[#allocation2] sm:$0x1] }
 0x662   : > { %v1411_v44 = vpop.f32.mrf.mxu2  ;;  %v1457_v45 = vpop.f32.mrf.mxu3 }
 0x663   : > { %v1412_v46 = vadd.f32 %v1411_v44, %v2972_v29  ;;  %v1458_v47 = vadd.f32 %v1457_v45, %v2972_v29  ;;  %v1321_v49 = vpop.f32.mrf.mxu0  ;;  %v1367_v50 = vpop.f32.mrf.mxu1 }
 0x665   : > { %1416 = vst.msk [vmem:[#allocation2 + $0x18] sm:$0x7] %vm1142_vm6, %v1412_v46  ;;  %v1863_v20 = vld [vmem:[#allocation2 + $0x12] sm:$0x1]  ;;  %v3006_v23 = vld [vmem:[#allocation2 + $0x11] sm:$0x1] }
 0x666   : > { %1462 = vst.msk [vmem:[#allocation2 + $0x1c] sm:$0x7] %vm1142_vm6, %v1458_v47  ;;  %v2042_v38 = vrot.slane %v1863_v20, 4  ;;  %v1945_v40 = vrot.slane %v3006_v23, 4 }
 0x66a   : > { %v1413_v51 = vpop.f32.mrf.mxu2  ;;  %v1459_v52 = vpop.f32.mrf.mxu3 }
 0x66b   : > { %v1502_v53 = vpop.f32.mrf.mxu0  ;;  %v1547_v54 = vpop.f32.mrf.mxu1  ;;  %v1864_v51 = vld [vmem:[#allocation2 + $0x16] sm:$0x1]  ;;  %v1848_v52 = vld [vmem:[#allocation2 + $0x15] sm:$0x1] }
 0x66c   : > { %v1503_v55 = vadd.f32 %v1502_v53, %v2972_v29  ;;  %v1548_v56 = vadd.f32 %v1547_v54, %v2972_v29  ;;  %v2044_v13 = vrot.slane %v1864_v51, 3  ;;  %v1947_v16 = vrot.slane %v1848_v52, 3 }
 0x66d   : > { %v1850_v14 = vld [vmem:[#allocation2 + $0x1d] sm:$0x1] }
 0x66e   : > { %1507 = vst.msk [vmem:[#allocation2 + $0x20] sm:$0x7] %vm1142_vm6, %v1503_v55  ;;  %v3017_v55 = vld [vmem:[#allocation2 + $0x1a] sm:$0x1] }
 0x66f   : > { %1552 = vst.msk [vmem:[#allocation2 + $0x24] sm:$0x7] %vm1142_vm6, %v1548_v56  ;;  %v1831_v56 = vld [vmem:[#allocation2 + $0x10] sm:$0x1]  ;;  %v2046_v17 = vrot.slane %v3017_v55, 2 }
 0x670   : > { %v1897_v19 = vrot.slane %v1831_v56, 4 }
 0x672   : > { %v1592_v57 = vpop.f32.mrf.mxu2  ;;  %v1637_v58 = vpop.f32.mrf.mxu3 }
 0x673   : > { %v1593_v59 = vadd.f32 %v1592_v57, %v2972_v29  ;;  %v1638_v60 = vadd.f32 %v1637_v58, %v2972_v29  ;;  %v1504_v61 = vpop.f32.mrf.mxu0  ;;  %v1549_v62 = vpop.f32.mrf.mxu1  ;;  %v3019_v57 = vld [vmem:[#allocation2 + $0x14] sm:$0x1]  ;;  %v1892_v58 = vsel %vm295_vm0, %v1891_v15, %v1827_v41 }
 0x674   : > { %v1944_v61 = vsel %vm301_vm2, %v1943_v31, %v1942_v33  ;;  %v1894_v62 = vsel %vm298_vm1, %v1893_v0, %v1892_v58  ;;  %v1900_v21 = vrot.slane %v3019_v57, 3  ;;  %v1951_v31 = vrot.slane %v1850_v14, 1 }
 0x675   : > { %1597 = vst.msk [vmem:[#allocation2 + $0x28] sm:$0x7] %vm1142_vm6, %v1593_v59  ;;  %v1851_v53 = vld [vmem:[#allocation2 + $0x21] sm:$0x1]  ;;  %v1867_v54 = vld [vmem:[#allocation2 + $0x22] sm:$0x1]  ;;  %v1946_v15 = vsel %vm1898_vm5, %v1945_v40, %v1944_v61 }
 0x676   : > { %1642 = vst.msk [vmem:[#allocation2 + $0x2c] sm:$0x7] %vm1142_vm6, %v1638_v60  ;;  %v1852_v24 = vld [vmem:[#allocation2 + $0x25] sm:$0x1]  ;;  %v1868_v25 = vld [vmem:[#allocation2 + $0x26] sm:$0x1]  ;;  %v2041_v60 = vsel %vm301_vm2, %v2040_v48, %v2039_v32 }
 0x677   : > { %v1953_v36 = vrot.slane %v1852_v24, 7  ;;  %v2050_v37 = vrot.slane %v1868_v25, 7  ;;  %v2043_v12 = vsel %vm1898_vm5, %v2042_v38, %v2041_v60  ;;  %v1833_v32 = vld [vmem:[#allocation2 + $0x18] sm:$0x1]  ;;  %v1836_v33 = vld [vmem:[#allocation2 + $0x24] sm:$0x1] }
 0x678   : > { %v1909_v51 = vrot.slane %v1836_v33, 7  ;;  %v1903_v55 = vrot.slane %v1833_v32, 2  ;;  %v1835_v60 = vld [vmem:[#allocation2 + $0x20] sm:$0x1] }
 0x679   : > { %v1954_v63 = vsel %vm295_vm0, %v1953_v36, %v1851_v53  ;;  %v2051_v2 = vsel %vm295_vm0, %v2050_v37, %v1867_v54  ;;  %v1896_v36 = vsel %vm301_vm2, %v1895_v34, %v1894_v62  ;;  %v1834_v54 = vld [vmem:[#allocation2 + $0x1c] sm:$0x1] }
 0x67a   : > { %v1594_v3 = vpop.f32.mrf.mxu2  ;;  %v1639_v4 = vpop.f32.mrf.mxu3  ;;  %v1906_v62 = vrot.slane %v1834_v54, 1 }
 0x67b   : > { %v1683_v7 = vpop.f32.mrf.mxu0  ;;  %v1729_v8 = vpop.f32.mrf.mxu1  ;;  %v1849_v4 = vld [vmem:[#allocation2 + $0x19] sm:$0x1] }
 0x67c   : > { %v1684_v10 = vadd.f32 %v1683_v7, %v2972_v29  ;;  %v1730_v11 = vadd.f32 %v1729_v8, %v2972_v29  ;;  %v1853_v26 = vld [vmem:[#allocation2 + $0x29] sm:$0x1]  ;;  %v1869_v27 = vld [vmem:[#allocation2 + $0x2a] sm:$0x1]  ;;  %v1949_v18 = vrot.slane %v1849_v4, 2 }
 0x67d   : > { %v1854_v46 = vld [vmem:[#allocation2 + $0x2d] sm:$0x1]  ;;  %v1955_v47 = vrot.slane %v1853_v26, 6  ;;  %v1870_v49 = vld [vmem:[#allocation2 + $0x2e] sm:$0x1]  ;;  %v2052_v50 = vrot.slane %v1869_v27, 6 }
 0x67e   : > { %1688 = vst.msk [vmem:[#allocation2 + $0x30] sm:$0x7] %vm1142_vm6, %v1684_v10  ;;  %v1957_v1 = vrot.slane %v1854_v46, 5  ;;  %v2054_v3 = vrot.slane %v1870_v49, 5  ;;  %v1837_v37 = vld [vmem:[#allocation2 + $0x28] sm:$0x1] }
 0x67f   : > { %1734 = vst.msk [vmem:[#allocation2 + $0x34] sm:$0x7] %vm1142_vm6, %v1730_v11  ;;  %v1956_v6 = vsel %vm298_vm1, %v1955_v47, %v1954_v63  ;;  %v2053_v9 = vsel %vm298_vm1, %v2052_v50, %v2051_v2  ;;  %v1866_v11 = vld [vmem:[#allocation2 + $0x1e] sm:$0x1]  ;;  %v1838_v56 = vld [vmem:[#allocation2 + $0x2c] sm:$0x1]  ;;  %v1910_v63 = vsel %vm295_vm0, %v1909_v51, %v1835_v60 }
 0x680   : > { %v1958_v24 = vsel %vm301_vm2, %v1957_v1, %v1956_v6  ;;  %v2055_v26 = vsel %vm301_vm2, %v2054_v3, %v2053_v9  ;;  %v2048_v30 = vrot.slane %v1866_v11, 1  ;;  %v1911_v57 = vrot.slane %v1837_v37, 6 }
 0x681   : > { %v1913_v1 = vrot.slane %v1838_v56, 5 }
 0x682   : > { %v1775_v35 = vpop.f32.mrf.mxu2  ;;  %v1821_v39 = vpop.f32.mrf.mxu3 }
 0x683   : > { %v1776_v42 = vadd.f32 %v1775_v35, %v2972_v29  ;;  %v1822_v43 = vadd.f32 %v1821_v39, %v2972_v29  ;;  %v1685_v44 = vpop.f32.mrf.mxu0  ;;  %v1731_v45 = vpop.f32.mrf.mxu1  ;;  %v2045_v39 = vsel %vm1901_vm14, %v2044_v13, %v2043_v12 }
 0x684   : > { %v1899_v44 = vsel %vm1898_vm5, %v1897_v19, %v1896_v36  ;;  %v2047_v34 = vsel %vm1904_vm15, %v2046_v17, %v2045_v39 }
 0x685   : > { %1780 = vst.msk [vmem:[#allocation2 + $0x38] sm:$0x7] %vm1142_vm6, %v1776_v42  ;;  %v1855_v29 = vld [vmem:[#allocation2 + $0x31] sm:$0x1]  ;;  %v1871_v59 = vld [vmem:[#allocation2 + $0x32] sm:$0x1]  ;;  %v1902_v61 = vsel %vm1901_vm14, %v1900_v21, %v1899_v44 }
 0x686   : > { %1826 = vst.msk [vmem:[#allocation2 + $0x3c] sm:$0x7] %vm1142_vm6, %v1822_v43  ;;  %v1856_v5 = vld [vmem:[#allocation2 + $0x35] sm:$0x1]  ;;  %v1959_v7 = vrot.slane %v1855_v29, 4  ;;  %v2056_v10 = vrot.slane %v1871_v59, 4  ;;  %v1948_v43 = vsel %vm1901_vm14, %v1947_v16, %v1946_v15  ;;  %v2049_v59 = vsel %vm1907_vm8, %v2048_v30, %v2047_v34 }
 0x687   : > { %v1872_v8 = vld [vmem:[#allocation2 + $0x36] sm:$0x1]  ;;  %v1961_v25 = vrot.slane %v1856_v5, 3  ;;  %v1950_v58 = vsel %vm1904_vm15, %v1949_v18, %v1948_v43  ;;  %v1839_v29 = vld [vmem:[#allocation2 + $0x30] sm:$0x1]  ;;  %v1905_v3 = vsel %vm1904_vm15, %v1903_v55, %v1902_v61  ;;  %v1912_v5 = vsel %vm298_vm1, %v1911_v57, %v1910_v63 }
 0x688   : > { %v2058_v27 = vrot.slane %v1872_v8, 3  ;;  %v1960_v28 = vsel %vm1898_vm5, %v1959_v7, %v1958_v24  ;;  %v2057_v48 = vsel %vm1898_vm5, %v2056_v10, %v2055_v26  ;;  %v1952_v2 = vsel %vm1907_vm8, %v1951_v31, %v1950_v58  ;;  %v1840_v4 = vld [vmem:[#allocation2 + $0x34] sm:$0x1] }
 0x689   : > { %v1962_v45 = vsel %vm1901_vm14, %v1961_v25, %v1960_v28  ;;  %v1915_v6 = vrot.slane %v1839_v29, 4  ;;  %v1908_v8 = vsel %vm1907_vm8, %v1906_v62, %v1905_v3  ;;  %v1914_v9 = vsel %vm301_vm2, %v1913_v1, %v1912_v5 }
 0x68a   : > { %v1777_v20 = vpop.f32.mrf.mxu2  ;;  %v1823_v23 = vpop.f32.mrf.mxu3  ;;  %v2059_v47 = vsel %vm1901_vm14, %v2058_v27, %v2057_v48  ;;  %v1917_v10 = vrot.slane %v1840_v4, 3 }
 0x68b   : > { %v1916_v12 = vsel %vm1898_vm5, %v1915_v6, %v1914_v9 }
 0x68c   : > { %v1857_v0 = vld [vmem:[#allocation2 + $0x39] sm:$0x1]  ;;  %v1873_v35 = vld [vmem:[#allocation2 + $0x3a] sm:$0x1]  ;;  %v1841_v7 = vld [vmem:[#allocation2 + $0x38] sm:$0x1]  ;;  %v1918_v14 = vsel %vm1901_vm14, %v1917_v10, %v1916_v12 }
 0x68d   : > { %v1858_v38 = vld [vmem:[#allocation2 + $0x3d] sm:$0x1]  ;;  %v1963_v40 = vrot.slane %v1857_v0, 2  ;;  %v1874_v41 = vld [vmem:[#allocation2 + $0x3e] sm:$0x1]  ;;  %v2060_v42 = vrot.slane %v1873_v35, 2 }
 0x68e   : > { %v1965_v46 = vrot.slane %v1858_v38, 1  ;;  %v2062_v49 = vrot.slane %v1874_v41, 1  ;;  %v1842_v11 = vld [vmem:[#allocation2 + $0x3c] sm:$0x1]  ;;  %v1919_v13 = vrot.slane %v1841_v7, 2 }
 0x68f   : > { %v1964_v50 = vsel %vm1904_vm15, %v1963_v40, %v1962_v45  ;;  %v2061_v22 = vsel %vm1904_vm15, %v2060_v42, %v2059_v47  ;;  %v1921_v15 = vrot.slane %v1842_v11, 1 }
 0x690   : > { %v1966_v52 = vsel %vm1907_vm8, %v1965_v46, %v1964_v50  ;;  %v3052_v53 = vsel %vm1907_vm8, %v2062_v49, %v2061_v22  ;;  %v1920_v16 = vsel %vm1904_vm15, %v1919_v13, %v1918_v14 }
 0x691   : > { %2334 = vmatpush.xpose.msk.msrb.mxu0 %vm304_vm3, %v1966_v52  ;;  %2086 = vmatpush.msrb.mxu1 %v3052_v53  ;;  %v1922_v17 = vsel %vm1907_vm8, %v1921_v15, %v1920_v16 }
 0x693   : > { %2087 = vmatpush.msrb.mxu1 %v2049_v59 }
 0x695   : > { %2335 = vmatpush.xpose.msk.msrb.mxu0 %vm304_vm3, %v1952_v2 }
 0x698   : > { %2336 = vmatmul.msk.f32.vlgmr.msrb.gmra.mxu0 %vm304_vm3, %v1908_v8 }
 0x6a0   : > { %2337 = vmatmul.msk.f32.gmra.mxu0 %vm304_vm3, %v1922_v17 }
 0x715   : > { %v1992_v18 = vpop.f32.mrf.mxu0 }
 0x716   : > { %v1998_v19 = vsel %vm304_vm3, %v1992_v18, -inf }
 0x717   : > { %1999 = vmax.xlane.f32.xlu2 %v1998_v19 }
 0x71d   : > { %v1995_v21 = vpop.f32.mrf.mxu0 }
 0x71e   : > { %v2001_v20 = vsel %vm304_vm3, %v1995_v21, -inf }
 0x71f   : > { %2002 = vmax.xlane.f32.xlu1 %v2001_v20 }
 0x78a   : > { %v2000_v23 = vpop.xlane.xlu2 %1999 }
 0x78b   : > { %v2004_v24 = vsub.f32 %v1992_v18, %v2000_v23 }
 0x78d   : > { %v2006_v25 = vmul.f32 1.442695, %v2004_v24 }
 0x78f   : > { %2414 = vpow2.f32 %v2006_v25 }
 0x792   : > { %v2003_v26 = vpop.xlane.xlu1 %2002 }
 0x793   : > { %v2005_v27 = vsub.f32 %v1995_v21, %v2003_v26 }
 0x795   : > { %v2415_v28 = vpop.eup %2414  ;;  %v2008_v48 = vmul.f32 1.442695, %v2005_v27 }
 0x796   : > { %v2010_v30 = vsel %vm304_vm3, %v2415_v28, 0.0 }
 0x797   : > { %2416 = vpow2.f32 %v2008_v48  ;;  %2011 = vadd.xlane.f32.xlu0 %v2010_v30 }
 0x79d   : > { %v2417_v31 = vpop.eup %2416 }
 0x79e   : > { %v2013_v32 = vsel %vm304_vm3, %v2417_v31, 0.0 }
 0x79f   : > { %2014 = vadd.xlane.f32.xlu0 %v2013_v32 }
 0x80a   : > { %v2012_v33 = vpop.xlane.xlu0 %2011 }
 0x80b   : > { %2418 = vrcp.f32 %v2012_v33 }
 0x811   : > { %v2419_v0 = vpop.eup %2418 }
 0x812   : > { %v2018_v35 = vmul.f32 %v2419_v0, %v2415_v28  ;;  %v2015_v39 = vpop.xlane.xlu0 %2014 }
 0x813   : > { %2420 = vrcp.f32 %v2015_v39 }
 0x814   : > { %2338 = vmatmul.msk.f32.vlgmr.msrb.gmra.mxu1 %vm304_vm3, %v2018_v35 }
 0x819   : > { %v2421_v36 = vpop.eup %2420 }
 0x81a   : > { %v2019_v37 = vmul.f32 %v2421_v36, %v2417_v31 }
 0x81c   : > { %2339 = vmatmul.msk.f32.gmra.mxu1 %vm304_vm3, %v2019_v37 }
 0x891   : > { %v2089_v38 = vpop.f32.mrf.mxu1 }
 0x892   : > { %v2090_v40 = vadd.f32 %v2089_v38, %v2049_v59 }
 0x894   : > { %2095 = vst.msk [vmem:[%s271_s17] sm:$0xff] %vm304_vm3, %v2090_v40 }
 0x899   : > { %v2092_v41 = vpop.f32.mrf.mxu1 }
 0x89a   : > { %v2093_v42 = vadd.f32 %v2092_v41, %v3052_v53 }
 0x89c   : > { %2096 = vst.msk [vmem:[%s271_s17 + $0x8] sm:$0xff] %vm304_vm3, %v2093_v42 }
 0x89d   : > { %2479 = shalt.err (!%p2476_p4)
}
 0x89e   : > { %s2527_s18 = smov 128   ;;  %s2528_s8 = smov 8  }
 0x89f   : > { %2350 = dma.vmem_to_hbm [thread:$0]  (%p2614_p11), %s2111_s13, 256, %s2113_s7, %s2098_s14, %s2527_s18, %s2527_s18, %s2528_s8  }
 0x8a0 PF: > { %s2127_s17 = sand.u32 1, %s2506_s21   ;;  %p3127_p7 = scmp.ge.s32.totalorder %s2518_s24, 2 }
 0x8a1   : > { %s2128_s19 = scalar_lea.sflag [#allocation5], %s2127_s17 }
 0x8a2   : > { %p2357_p5 = pnand %p3127_p7, %p2618_p12 }
 0x8a4   : > { %p2358_p8 = pneg %p2357_p5 }
 0x8a6   : > { %2501 = dma.done.wait (%p2358_p8), %s2128_s19, 256  }
 0x8a7   : > { %2503 = vsyncadd (%p2358_p8), %s2128_s19, 4294967040  ;;  %p19_p10 = scmp.ge.s32.totalorder %s2589_s27, 4   ;;  %s3128_s21 = smov %s2510_s22 }
 0x8a8   : > { %s3129_s22 = smov %s2514_s23  ;;  %s3130_s23 = smov %s2601_s30 }
 0x8a9   : > { %s3131_s24 = smov %s2589_s27  ;;  %21 = sbr.rel (!%p19_p10) target bundleno = 5 (0x5), region = 104 }
 0x8ae   :  { %2134 = vsyncpa [#allocation4], 1 }
 0x8af   :  { %2136 = vsyncpa [#allocation4 + $0x1], 1 }
 0x8b0   :  { %2137 = vsyncpa [#allocation5], 1 }
 0x8b1   :  { %2139 = vsyncpa [#allocation5 + $0x1], 1 }

</bundles_post_ra>
